<compile_context>
chip_gen: v6e
topology: v6e:2x2x1
jax: 0.10.0
libtpu: 0.0.40
codegen_flags: <defaults>
</compile_context>

<pallas_src>
import jax
import jax.numpy as jnp
from jax.experimental import pallas as pl
from jax.experimental.pallas import tpu as pltpu


# ----------------------------- config (small) -------------------------------
B = 2            # batch
S = 8            # sequence length
H = 32           # hidden size (== pooler_fc_size of this synthetic config)
NH = 2           # attention heads
DH = H // NH     # head dim
I = 64           # FFN intermediate size
L = 2            # number of transformer layers
V = 64           # vocab size
NTYPE = 2        # token-type vocab
MAXPOS = 16      # max positions
E = 16           # embedding_size of the fc head
LN_EPS = 1e-12   # BERT layernorm eps
BS = B * S


# ------------------------------- kernel --------------------------------------
def _layernorm(x, g, b):
    mean = jnp.mean(x, axis=-1, keepdims=True)
    c = x - mean
    var = jnp.mean(c * c, axis=-1, keepdims=True)
    return c * jax.lax.rsqrt(var + LN_EPS) * g + b


def _bf16(x):
    return x.astype(jnp.bfloat16)


def _model_kernel(emb_ref, mask_ref, embln_ref,
                  wqkv_ref, bqkv_ref, wo_ref, wi_ref, bi_ref, wo2_ref,
                  lnslab_ref, poolw_ref, poolb_ref, fcw_ref, fcb_ref,
                  out_ref):
    """Entire model in one call: embedding LN -> L unrolled transformer layers
    -> pooler (tanh on [CLS]) -> fc.  The (BS, H) residual stream lives in
    registers the whole time; all matmul operands are bf16."""
    scale = 1.0 / (DH ** 0.5)

    # ---- embedding layernorm (gamma row 0 / beta row 1 of the packed slab) ----
    h = _layernorm(emb_ref[...], embln_ref[0:1, :], embln_ref[1:2, :])   # (BS, H) f32
    mask = mask_ref[...]                                                 # (B, S) additive bias

    for layer in range(L):                       # unrolled: L is tiny and static
        wqkv = wqkv_ref[layer]                   # (H, 3*NH*DH) bf16
        bqkv = bqkv_ref[layer]                   # (1, 3*NH*DH) f32
        wo = wo_ref[layer]                       # (NH*DH, H)   bf16
        wi = wi_ref[layer]                       # (H, I)       bf16
        bi = bi_ref[layer]                       # (1, I)       f32
        wo2 = wo2_ref[layer]                     # (I, H)       bf16
        slab = lnslab_ref[layer]                 # (6, H) f32: bo|ln1g|ln1b|bo2|ln2g|ln2b
        bo = slab[0:1, :]
        ln1g, ln1b = slab[1:2, :], slab[2:3, :]
        bo2 = slab[3:4, :]
        ln2g, ln2b = slab[4:5, :], slab[5:6, :]

        # ---- fused QKV projection: one (BS,H)x(H,96) matmul ----
        qkv = jnp.dot(_bf16(h), wqkv, preferred_element_type=jnp.float32) + bqkv

        # ---- scaled-dot-product attention; contexts kept in registers ----
        ctx_rows = []
        for b in range(B):
            r0 = b * S
            mb = mask[b:b + 1, :]                          # (1, S) broadcasts over (S, S)
            head_ctx = []
            for hh in range(NH):
                q = qkv[r0:r0 + S, hh * DH:(hh + 1) * DH]              # (S, DH)
                k = qkv[r0:r0 + S, (NH + hh) * DH:(NH + hh + 1) * DH]
                v = qkv[r0:r0 + S, (2 * NH + hh) * DH:(2 * NH + hh + 1) * DH]
                # q @ k^T without materializing a transpose.
                s = jax.lax.dot_general(_bf16(q), _bf16(k),
                                        (((1,), (1,)), ((), ())),
                                        preferred_element_type=jnp.float32)
                s = s * scale + mb
                s = s - jnp.max(s, axis=-1, keepdims=True)
                p = jnp.exp(s)
                p = p * pl.reciprocal(jnp.sum(p, axis=-1, keepdims=True), approx=True)
                head_ctx.append(jnp.dot(_bf16(p), _bf16(v),
                                        preferred_element_type=jnp.float32))
            ctx_rows.append(jnp.concatenate(head_ctx, axis=-1))         # (S, NH*DH)
        ctx = jnp.concatenate(ctx_rows, axis=0)                         # (BS, NH*DH)

        # ---- fused output projection + bias + residual + LN ----
        attn = jnp.dot(_bf16(ctx), wo, preferred_element_type=jnp.float32) + bo
        h1 = _layernorm(attn + h, ln1g, ln1b)

        # ---- FFN (matmul + gelu + matmul + bias + residual + LN, fused) ----
        ff = jnp.dot(_bf16(h1), wi, preferred_element_type=jnp.float32) + bi
        # TODO(synk): HF BERT uses exact erf-GELU; tanh approximation used here.
        ff = jax.nn.gelu(ff, approximate=True)
        ff = jnp.dot(_bf16(ff), wo2, preferred_element_type=jnp.float32) + bo2
        h = _layernorm(ff + h1, ln2g, ln2b)

    # ---- pooler (tanh dense on [CLS]) + fc head: direct static CLS-row reads ----
    cls = jnp.concatenate([h[b * S:b * S + 1, :] for b in range(B)], axis=0)  # (B, H)
    pooled = jnp.tanh(jnp.dot(_bf16(cls), poolw_ref[...],
                              preferred_element_type=jnp.float32) + poolb_ref[...])
    out_ref[...] = (jnp.dot(_bf16(pooled), fcw_ref[...],
                            preferred_element_type=jnp.float32) + fcb_ref[...])


# --------------------------- pallas_call wrapper ------------------------------
def bert_pooled_fc(emb, mask_bias, p):
    """emb: (B*S, H) summed embeddings (f32); mask_bias: (B, S) additive bias (f32)."""
    # No grid: every operand is a full-array VMEM block; all weights fit easily
    # (~40 KB bf16), so there is nothing to stream / pipeline at this size.
    return pl.pallas_call(
        _model_kernel,
        out_shape=jax.ShapeDtypeStruct((B, E), jnp.float32),
    )(emb, mask_bias,
      p["emb_ln"],
      p["wqkv"], p["bqkv"], p["wo"], p["wi"], p["bi"], p["wo2"],
      p["ln_slab"],
      p["pool_w"], p["pool_b"], p["fc_w"], p["fc_b"])


# --------------------------- parameter creation ------------------------------
def init_params(key):
    """Dense weights are generated directly in kernel layout:
    (in, out), bf16, stacked over layers; QKV packed as (L, H, 3*NH*DH) with
    [q heads | k heads | v heads] along the last (lane) dim; per-layer
    bias/LN vectors packed into one (L, 6, H) f32 slab."""
    def nrm(k, shape, scale=0.02, dtype=jnp.bfloat16):
        return (scale * jax.random.normal(k, shape, dtype=jnp.float32)).astype(dtype)

    ks = jax.random.split(key, 9)
    ones_h = jnp.ones((L, 1, H), jnp.float32)
    zeros_h = jnp.zeros((L, 1, H), jnp.float32)
    # rows: [attn-out bias, LN1 gamma, LN1 beta, FFN-out bias, LN2 gamma, LN2 beta]
    ln_slab = jnp.concatenate(
        [zeros_h, ones_h, zeros_h, zeros_h, ones_h, zeros_h], axis=1)   # (L, 6, H)

    return {
        "word_emb": nrm(ks[0], (V, H), dtype=jnp.float32),
        "pos_emb": nrm(ks[1], (MAXPOS, H), dtype=jnp.float32),
        "type_emb": nrm(ks[2], (NTYPE, H), dtype=jnp.float32),
        "emb_ln": jnp.concatenate([jnp.ones((1, H), jnp.float32),
                                   jnp.zeros((1, H), jnp.float32)], axis=0),  # (2, H)
        "wqkv": nrm(ks[3], (L, H, 3 * NH * DH)),                # bf16
        "bqkv": jnp.zeros((L, 1, 3 * NH * DH), jnp.float32),
        "wo": nrm(ks[4], (L, NH * DH, H)),                      # bf16
        "wi": nrm(ks[5], (L, H, I)),                            # bf16
        "bi": jnp.zeros((L, 1, I), jnp.float32),
        "wo2": nrm(ks[6], (L, I, H)),                           # bf16
        "ln_slab": ln_slab,                                     # (L, 6, H) f32
        "pool_w": nrm(ks[7], (H, H)),                           # bf16
        "pool_b": jnp.zeros((1, H), jnp.float32),
        "fc_w": nrm(ks[8], (H, E)),                             # bf16
        "fc_b": jnp.zeros((1, E), jnp.float32),
    }


# ------------------------------ forward pass ---------------------------------
def text_relevance_forward(params, input_ids, token_type_ids, attention_mask):
    # Embedding-table gathers stay as tiny XLA glue; everything downstream runs
    # in the single fused Pallas kernel.
    pos_ids = jnp.arange(S, dtype=jnp.int32)
    emb = (jnp.take(params["word_emb"], input_ids, axis=0)
           + jnp.take(params["pos_emb"], pos_ids, axis=0)[None, :, :]
           + jnp.take(params["type_emb"], token_type_ids, axis=0))
    emb = emb.reshape(BS, H)

    # Additive attention bias, (B, S); broadcast over query rows happens in-kernel.
    mask_bias = (1.0 - attention_mask.astype(jnp.float32)) * -10000.0       # (B, S)

    return bert_pooled_fc(emb, mask_bias, params)                           # (B, E)


# ---------------------------------- main --------------------------------------
if __name__ == "__main__":
    key = jax.random.PRNGKey(0)
    k_param, k_ids = jax.random.split(key)

    params = init_params(k_param)
    input_ids = jax.random.randint(k_ids, (B, S), 0, V, dtype=jnp.int32)
    token_type_ids = jnp.zeros((B, S), dtype=jnp.int32)
    attention_mask = jnp.ones((B, S), dtype=jnp.int32)

    out = jax.jit(text_relevance_forward)(params, input_ids, token_type_ids,
                                          attention_mask)
    out = jax.block_until_ready(out)
    assert out.shape == (B, E) and out.dtype == jnp.float32
    print("KERNEL_OK")
</pallas_src>

<mosaic_0001>
module attributes {stable_mosaic.version = 11 : i64} {
  func.func @_model_kernel(%arg0: memref<16x32xf32, #tpu.memory_space<vmem>>, %arg1: memref<2x8xf32, #tpu.memory_space<vmem>>, %arg2: memref<2x32xf32, #tpu.memory_space<vmem>>, %arg3: memref<2x32x96xbf16, #tpu.memory_space<vmem>>, %arg4: memref<2x1x96xf32, #tpu.memory_space<vmem>>, %arg5: memref<2x32x32xbf16, #tpu.memory_space<vmem>>, %arg6: memref<2x32x64xbf16, #tpu.memory_space<vmem>>, %arg7: memref<2x1x64xf32, #tpu.memory_space<vmem>>, %arg8: memref<2x64x32xbf16, #tpu.memory_space<vmem>>, %arg9: memref<2x6x32xf32, #tpu.memory_space<vmem>>, %arg10: memref<32x32xbf16, #tpu.memory_space<vmem>>, %arg11: memref<1x32xf32, #tpu.memory_space<vmem>>, %arg12: memref<32x16xbf16, #tpu.memory_space<vmem>>, %arg13: memref<1x16xf32, #tpu.memory_space<vmem>>, %arg14: memref<2x16xf32, #tpu.memory_space<vmem>>) attributes {dimension_semantics = [], scalar_prefetch = 0 : i64, scratch_operands = 0 : i64, tpu.core_type = #tpu.core_type<tc>} {
    %c0 = arith.constant 0 : index
    %c0_0 = arith.constant 0 : index
    %0 = vector.load %arg0[%c0, %c0_0] : memref<16x32xf32, #tpu.memory_space<vmem>>, vector<16x32xf32>
    %c0_1 = arith.constant 0 : index
    %c0_2 = arith.constant 0 : index
    %1 = vector.load %arg2[%c0_1, %c0_2] : memref<2x32xf32, #tpu.memory_space<vmem>>, vector<1x32xf32>
    %c1 = arith.constant 1 : index
    %c0_3 = arith.constant 0 : index
    %2 = vector.load %arg2[%c1, %c0_3] : memref<2x32xf32, #tpu.memory_space<vmem>>, vector<1x32xf32>
    %cst = arith.constant dense<0.000000e+00> : vector<16xf32>
    %3 = vector.multi_reduction <add>, %0, %cst [1] : vector<16x32xf32> to vector<16xf32>
    %4 = vector.shape_cast %3 : vector<16xf32> to vector<16x1xf32>
    %cst_4 = arith.constant 3.200000e+01 : f32
    %5 = vector.broadcast %cst_4 : f32 to vector<16x1xf32>
    %6 = arith.divf %4, %5 : vector<16x1xf32>
    %7 = vector.broadcast %6 : vector<16x1xf32> to vector<16x32xf32>
    %8 = arith.subf %0, %7 : vector<16x32xf32>
    %9 = arith.mulf %8, %8 : vector<16x32xf32>
    %cst_5 = arith.constant dense<0.000000e+00> : vector<16xf32>
    %10 = vector.multi_reduction <add>, %9, %cst_5 [1] : vector<16x32xf32> to vector<16xf32>
    %11 = vector.shape_cast %10 : vector<16xf32> to vector<16x1xf32>
    %cst_6 = arith.constant 3.200000e+01 : f32
    %12 = vector.broadcast %cst_6 : f32 to vector<16x1xf32>
    %13 = arith.divf %11, %12 : vector<16x1xf32>
    %cst_7 = arith.constant 9.99999996E-13 : f32
    %14 = vector.broadcast %cst_7 : f32 to vector<16x1xf32>
    %15 = arith.addf %13, %14 : vector<16x1xf32>
    %16 = math.rsqrt %15 : vector<16x1xf32>
    %17 = vector.broadcast %16 : vector<16x1xf32> to vector<16x32xf32>
    %18 = arith.mulf %8, %17 : vector<16x32xf32>
    %19 = vector.broadcast %1 : vector<1x32xf32> to vector<16x32xf32>
    %20 = arith.mulf %18, %19 : vector<16x32xf32>
    %21 = vector.broadcast %2 : vector<1x32xf32> to vector<16x32xf32>
    %22 = arith.addf %20, %21 : vector<16x32xf32>
    %c0_8 = arith.constant 0 : index
    %c0_9 = arith.constant 0 : index
    %23 = vector.load %arg1[%c0_8, %c0_9] : memref<2x8xf32, #tpu.memory_space<vmem>>, vector<2x8xf32>
    %c0_10 = arith.constant 0 : index
    %c0_11 = arith.constant 0 : index
    %c0_12 = arith.constant 0 : index
    %24 = vector.load %arg3[%c0_10, %c0_11, %c0_12] : memref<2x32x96xbf16, #tpu.memory_space<vmem>>, vector<1x32x96xbf16>
    %25 = vector.shape_cast %24 : vector<1x32x96xbf16> to vector<32x96xbf16>
    %c0_13 = arith.constant 0 : index
    %c0_14 = arith.constant 0 : index
    %c0_15 = arith.constant 0 : index
    %26 = vector.load %arg4[%c0_13, %c0_14, %c0_15] : memref<2x1x96xf32, #tpu.memory_space<vmem>>, vector<1x1x96xf32>
    %27 = vector.shape_cast %26 : vector<1x1x96xf32> to vector<1x96xf32>
    %c0_16 = arith.constant 0 : index
    %c0_17 = arith.constant 0 : index
    %c0_18 = arith.constant 0 : index
    %28 = vector.load %arg5[%c0_16, %c0_17, %c0_18] : memref<2x32x32xbf16, #tpu.memory_space<vmem>>, vector<1x32x32xbf16>
    %29 = vector.shape_cast %28 : vector<1x32x32xbf16> to vector<32x32xbf16>
    %c0_19 = arith.constant 0 : index
    %c0_20 = arith.constant 0 : index
    %c0_21 = arith.constant 0 : index
    %30 = vector.load %arg6[%c0_19, %c0_20, %c0_21] : memref<2x32x64xbf16, #tpu.memory_space<vmem>>, vector<1x32x64xbf16>
    %31 = vector.shape_cast %30 : vector<1x32x64xbf16> to vector<32x64xbf16>
    %c0_22 = arith.constant 0 : index
    %c0_23 = arith.constant 0 : index
    %c0_24 = arith.constant 0 : index
    %32 = vector.load %arg7[%c0_22, %c0_23, %c0_24] : memref<2x1x64xf32, #tpu.memory_space<vmem>>, vector<1x1x64xf32>
    %33 = vector.shape_cast %32 : vector<1x1x64xf32> to vector<1x64xf32>
    %c0_25 = arith.constant 0 : index
    %c0_26 = arith.constant 0 : index
    %c0_27 = arith.constant 0 : index
    %34 = vector.load %arg8[%c0_25, %c0_26, %c0_27] : memref<2x64x32xbf16, #tpu.memory_space<vmem>>, vector<1x64x32xbf16>
    %35 = vector.shape_cast %34 : vector<1x64x32xbf16> to vector<64x32xbf16>
    %c0_28 = arith.constant 0 : index
    %c0_29 = arith.constant 0 : index
    %c0_30 = arith.constant 0 : index
    %36 = vector.load %arg9[%c0_28, %c0_29, %c0_30] : memref<2x6x32xf32, #tpu.memory_space<vmem>>, vector<1x6x32xf32>
    %37 = vector.shape_cast %36 : vector<1x6x32xf32> to vector<6x32xf32>
    %38 = vector.extract_strided_slice %37 {offsets = [0, 0], sizes = [1, 32], strides = [1, 1]} : vector<6x32xf32> to vector<1x32xf32>
    %39 = vector.extract_strided_slice %37 {offsets = [1, 0], sizes = [1, 32], strides = [1, 1]} : vector<6x32xf32> to vector<1x32xf32>
    %40 = vector.extract_strided_slice %37 {offsets = [2, 0], sizes = [1, 32], strides = [1, 1]} : vector<6x32xf32> to vector<1x32xf32>
    %41 = vector.extract_strided_slice %37 {offsets = [3, 0], sizes = [1, 32], strides = [1, 1]} : vector<6x32xf32> to vector<1x32xf32>
    %42 = vector.extract_strided_slice %37 {offsets = [4, 0], sizes = [1, 32], strides = [1, 1]} : vector<6x32xf32> to vector<1x32xf32>
    %43 = vector.extract_strided_slice %37 {offsets = [5, 0], sizes = [1, 32], strides = [1, 1]} : vector<6x32xf32> to vector<1x32xf32>
    %44 = arith.truncf %22 : vector<16x32xf32> to vector<16x32xbf16>
    %cst_31 = arith.constant dense<0.000000e+00> : vector<16x96xf32>
    %45 = tpu.matmul %44, %25, %cst_31 {dimension_numbers = #tpu.dot_dimension_numbers<[1], [0], [0], [1], [0, 0, 1, 1], [], []>} : vector<16x32xbf16>, vector<32x96xbf16>, vector<16x96xf32> -> vector<16x96xf32>
    %46 = vector.broadcast %27 : vector<1x96xf32> to vector<16x96xf32>
    %47 = arith.addf %45, %46 : vector<16x96xf32>
    %48 = vector.extract_strided_slice %23 {offsets = [0, 0], sizes = [1, 8], strides = [1, 1]} : vector<2x8xf32> to vector<1x8xf32>
    %49 = vector.extract_strided_slice %47 {offsets = [0, 0], sizes = [8, 16], strides = [1, 1]} : vector<16x96xf32> to vector<8x16xf32>
    %50 = vector.extract_strided_slice %47 {offsets = [0, 32], sizes = [8, 16], strides = [1, 1]} : vector<16x96xf32> to vector<8x16xf32>
    %51 = vector.extract_strided_slice %47 {offsets = [0, 64], sizes = [8, 16], strides = [1, 1]} : vector<16x96xf32> to vector<8x16xf32>
    %52 = arith.truncf %49 : vector<8x16xf32> to vector<8x16xbf16>
    %53 = arith.truncf %50 : vector<8x16xf32> to vector<8x16xbf16>
    %cst_32 = arith.constant dense<0.000000e+00> : vector<8x8xf32>
    %54 = tpu.matmul %52, %53, %cst_32 {dimension_numbers = #tpu.dot_dimension_numbers<[1], [1], [0], [0], [0, 0, 1, 0], [], []>} : vector<8x16xbf16>, vector<8x16xbf16>, vector<8x8xf32> -> vector<8x8xf32>
    %cst_33 = arith.constant 2.500000e-01 : f32
    %55 = vector.broadcast %cst_33 : f32 to vector<8x8xf32>
    %56 = arith.mulf %54, %55 : vector<8x8xf32>
    %57 = vector.broadcast %48 : vector<1x8xf32> to vector<8x8xf32>
    %58 = arith.addf %56, %57 : vector<8x8xf32>
    %cst_34 = arith.constant dense<0xFF800000> : vector<8xf32>
    %59 = vector.multi_reduction <maximumf>, %58, %cst_34 [1] : vector<8x8xf32> to vector<8xf32>
    %60 = vector.shape_cast %59 : vector<8xf32> to vector<8x1xf32>
    %61 = vector.broadcast %60 : vector<8x1xf32> to vector<8x8xf32>
    %62 = arith.subf %58, %61 : vector<8x8xf32>
    %63 = math.exp %62 : vector<8x8xf32>
    %cst_35 = arith.constant dense<0.000000e+00> : vector<8xf32>
    %64 = vector.multi_reduction <add>, %63, %cst_35 [1] : vector<8x8xf32> to vector<8xf32>
    %65 = vector.shape_cast %64 : vector<8xf32> to vector<8x1xf32>
    %66 = tpu.reciprocal %65 {approx = true} : vector<8x1xf32> -> vector<8x1xf32>
    %67 = vector.broadcast %66 : vector<8x1xf32> to vector<8x8xf32>
    %68 = arith.mulf %63, %67 : vector<8x8xf32>
    %69 = arith.truncf %68 : vector<8x8xf32> to vector<8x8xbf16>
    %70 = arith.truncf %51 : vector<8x16xf32> to vector<8x16xbf16>
    %cst_36 = arith.constant dense<0.000000e+00> : vector<8x16xf32>
    %71 = tpu.matmul %69, %70, %cst_36 {dimension_numbers = #tpu.dot_dimension_numbers<[1], [0], [0], [1], [0, 0, 1, 1], [], []>} : vector<8x8xbf16>, vector<8x16xbf16>, vector<8x16xf32> -> vector<8x16xf32>
    %72 = vector.extract_strided_slice %47 {offsets = [0, 16], sizes = [8, 16], strides = [1, 1]} : vector<16x96xf32> to vector<8x16xf32>
    %73 = vector.extract_strided_slice %47 {offsets = [0, 48], sizes = [8, 16], strides = [1, 1]} : vector<16x96xf32> to vector<8x16xf32>
    %74 = vector.extract_strided_slice %47 {offsets = [0, 80], sizes = [8, 16], strides = [1, 1]} : vector<16x96xf32> to vector<8x16xf32>
    %75 = arith.truncf %72 : vector<8x16xf32> to vector<8x16xbf16>
    %76 = arith.truncf %73 : vector<8x16xf32> to vector<8x16xbf16>
    %cst_37 = arith.constant dense<0.000000e+00> : vector<8x8xf32>
    %77 = tpu.matmul %75, %76, %cst_37 {dimension_numbers = #tpu.dot_dimension_numbers<[1], [1], [0], [0], [0, 0, 1, 0], [], []>} : vector<8x16xbf16>, vector<8x16xbf16>, vector<8x8xf32> -> vector<8x8xf32>
    %cst_38 = arith.constant 2.500000e-01 : f32
    %78 = vector.broadcast %cst_38 : f32 to vector<8x8xf32>
    %79 = arith.mulf %77, %78 : vector<8x8xf32>
    %80 = vector.broadcast %48 : vector<1x8xf32> to vector<8x8xf32>
    %81 = arith.addf %79, %80 : vector<8x8xf32>
    %cst_39 = arith.constant dense<0xFF800000> : vector<8xf32>
    %82 = vector.multi_reduction <maximumf>, %81, %cst_39 [1] : vector<8x8xf32> to vector<8xf32>
    %83 = vector.shape_cast %82 : vector<8xf32> to vector<8x1xf32>
    %84 = vector.broadcast %83 : vector<8x1xf32> to vector<8x8xf32>
    %85 = arith.subf %81, %84 : vector<8x8xf32>
    %86 = math.exp %85 : vector<8x8xf32>
    %cst_40 = arith.constant dense<0.000000e+00> : vector<8xf32>
    %87 = vector.multi_reduction <add>, %86, %cst_40 [1] : vector<8x8xf32> to vector<8xf32>
    %88 = vector.shape_cast %87 : vector<8xf32> to vector<8x1xf32>
    %89 = tpu.reciprocal %88 {approx = true} : vector<8x1xf32> -> vector<8x1xf32>
    %90 = vector.broadcast %89 : vector<8x1xf32> to vector<8x8xf32>
    %91 = arith.mulf %86, %90 : vector<8x8xf32>
    %92 = arith.truncf %91 : vector<8x8xf32> to vector<8x8xbf16>
    %93 = arith.truncf %74 : vector<8x16xf32> to vector<8x16xbf16>
    %cst_41 = arith.constant dense<0.000000e+00> : vector<8x16xf32>
    %94 = tpu.matmul %92, %93, %cst_41 {dimension_numbers = #tpu.dot_dimension_numbers<[1], [0], [0], [1], [0, 0, 1, 1], [], []>} : vector<8x8xbf16>, vector<8x16xbf16>, vector<8x16xf32> -> vector<8x16xf32>
    %95 = tpu.concatenate %71, %94 in 1 : vector<8x16xf32>, vector<8x16xf32> -> vector<8x32xf32>
    %96 = vector.extract_strided_slice %23 {offsets = [1, 0], sizes = [1, 8], strides = [1, 1]} : vector<2x8xf32> to vector<1x8xf32>
    %97 = vector.extract_strided_slice %47 {offsets = [8, 0], sizes = [8, 16], strides = [1, 1]} : vector<16x96xf32> to vector<8x16xf32>
    %98 = vector.extract_strided_slice %47 {offsets = [8, 32], sizes = [8, 16], strides = [1, 1]} : vector<16x96xf32> to vector<8x16xf32>
    %99 = vector.extract_strided_slice %47 {offsets = [8, 64], sizes = [8, 16], strides = [1, 1]} : vector<16x96xf32> to vector<8x16xf32>
    %100 = arith.truncf %97 : vector<8x16xf32> to vector<8x16xbf16>
    %101 = arith.truncf %98 : vector<8x16xf32> to vector<8x16xbf16>
    %cst_42 = arith.constant dense<0.000000e+00> : vector<8x8xf32>
    %102 = tpu.matmul %100, %101, %cst_42 {dimension_numbers = #tpu.dot_dimension_numbers<[1], [1], [0], [0], [0, 0, 1, 0], [], []>} : vector<8x16xbf16>, vector<8x16xbf16>, vector<8x8xf32> -> vector<8x8xf32>
    %cst_43 = arith.constant 2.500000e-01 : f32
    %103 = vector.broadcast %cst_43 : f32 to vector<8x8xf32>
    %104 = arith.mulf %102, %103 : vector<8x8xf32>
    %105 = vector.broadcast %96 : vector<1x8xf32> to vector<8x8xf32>
    %106 = arith.addf %104, %105 : vector<8x8xf32>
    %cst_44 = arith.constant dense<0xFF800000> : vector<8xf32>
    %107 = vector.multi_reduction <maximumf>, %106, %cst_44 [1] : vector<8x8xf32> to vector<8xf32>
    %108 = vector.shape_cast %107 : vector<8xf32> to vector<8x1xf32>
    %109 = vector.broadcast %108 : vector<8x1xf32> to vector<8x8xf32>
    %110 = arith.subf %106, %109 : vector<8x8xf32>
    %111 = math.exp %110 : vector<8x8xf32>
    %cst_45 = arith.constant dense<0.000000e+00> : vector<8xf32>
    %112 = vector.multi_reduction <add>, %111, %cst_45 [1] : vector<8x8xf32> to vector<8xf32>
    %113 = vector.shape_cast %112 : vector<8xf32> to vector<8x1xf32>
    %114 = tpu.reciprocal %113 {approx = true} : vector<8x1xf32> -> vector<8x1xf32>
    %115 = vector.broadcast %114 : vector<8x1xf32> to vector<8x8xf32>
    %116 = arith.mulf %111, %115 : vector<8x8xf32>
    %117 = arith.truncf %116 : vector<8x8xf32> to vector<8x8xbf16>
    %118 = arith.truncf %99 : vector<8x16xf32> to vector<8x16xbf16>
    %cst_46 = arith.constant dense<0.000000e+00> : vector<8x16xf32>
    %119 = tpu.matmul %117, %118, %cst_46 {dimension_numbers = #tpu.dot_dimension_numbers<[1], [0], [0], [1], [0, 0, 1, 1], [], []>} : vector<8x8xbf16>, vector<8x16xbf16>, vector<8x16xf32> -> vector<8x16xf32>
    %120 = vector.extract_strided_slice %47 {offsets = [8, 16], sizes = [8, 16], strides = [1, 1]} : vector<16x96xf32> to vector<8x16xf32>
    %121 = vector.extract_strided_slice %47 {offsets = [8, 48], sizes = [8, 16], strides = [1, 1]} : vector<16x96xf32> to vector<8x16xf32>
    %122 = vector.extract_strided_slice %47 {offsets = [8, 80], sizes = [8, 16], strides = [1, 1]} : vector<16x96xf32> to vector<8x16xf32>
    %123 = arith.truncf %120 : vector<8x16xf32> to vector<8x16xbf16>
    %124 = arith.truncf %121 : vector<8x16xf32> to vector<8x16xbf16>
    %cst_47 = arith.constant dense<0.000000e+00> : vector<8x8xf32>
    %125 = tpu.matmul %123, %124, %cst_47 {dimension_numbers = #tpu.dot_dimension_numbers<[1], [1], [0], [0], [0, 0, 1, 0], [], []>} : vector<8x16xbf16>, vector<8x16xbf16>, vector<8x8xf32> -> vector<8x8xf32>
    %cst_48 = arith.constant 2.500000e-01 : f32
    %126 = vector.broadcast %cst_48 : f32 to vector<8x8xf32>
    %127 = arith.mulf %125, %126 : vector<8x8xf32>
    %128 = vector.broadcast %96 : vector<1x8xf32> to vector<8x8xf32>
    %129 = arith.addf %127, %128 : vector<8x8xf32>
    %cst_49 = arith.constant dense<0xFF800000> : vector<8xf32>
    %130 = vector.multi_reduction <maximumf>, %129, %cst_49 [1] : vector<8x8xf32> to vector<8xf32>
    %131 = vector.shape_cast %130 : vector<8xf32> to vector<8x1xf32>
    %132 = vector.broadcast %131 : vector<8x1xf32> to vector<8x8xf32>
    %133 = arith.subf %129, %132 : vector<8x8xf32>
    %134 = math.exp %133 : vector<8x8xf32>
    %cst_50 = arith.constant dense<0.000000e+00> : vector<8xf32>
    %135 = vector.multi_reduction <add>, %134, %cst_50 [1] : vector<8x8xf32> to vector<8xf32>
    %136 = vector.shape_cast %135 : vector<8xf32> to vector<8x1xf32>
    %137 = tpu.reciprocal %136 {approx = true} : vector<8x1xf32> -> vector<8x1xf32>
    %138 = vector.broadcast %137 : vector<8x1xf32> to vector<8x8xf32>
    %139 = arith.mulf %134, %138 : vector<8x8xf32>
    %140 = arith.truncf %139 : vector<8x8xf32> to vector<8x8xbf16>
    %141 = arith.truncf %122 : vector<8x16xf32> to vector<8x16xbf16>
    %cst_51 = arith.constant dense<0.000000e+00> : vector<8x16xf32>
    %142 = tpu.matmul %140, %141, %cst_51 {dimension_numbers = #tpu.dot_dimension_numbers<[1], [0], [0], [1], [0, 0, 1, 1], [], []>} : vector<8x8xbf16>, vector<8x16xbf16>, vector<8x16xf32> -> vector<8x16xf32>
    %143 = tpu.concatenate %119, %142 in 1 : vector<8x16xf32>, vector<8x16xf32> -> vector<8x32xf32>
    %144 = tpu.concatenate %95, %143 in 0 : vector<8x32xf32>, vector<8x32xf32> -> vector<16x32xf32>
    %145 = arith.truncf %144 : vector<16x32xf32> to vector<16x32xbf16>
    %cst_52 = arith.constant dense<0.000000e+00> : vector<16x32xf32>
    %146 = tpu.matmul %145, %29, %cst_52 {dimension_numbers = #tpu.dot_dimension_numbers<[1], [0], [0], [1], [0, 0, 1, 1], [], []>} : vector<16x32xbf16>, vector<32x32xbf16>, vector<16x32xf32> -> vector<16x32xf32>
    %147 = vector.broadcast %38 : vector<1x32xf32> to vector<16x32xf32>
    %148 = arith.addf %146, %147 : vector<16x32xf32>
    %149 = arith.addf %148, %22 : vector<16x32xf32>
    %cst_53 = arith.constant dense<0.000000e+00> : vector<16xf32>
    %150 = vector.multi_reduction <add>, %149, %cst_53 [1] : vector<16x32xf32> to vector<16xf32>
    %151 = vector.shape_cast %150 : vector<16xf32> to vector<16x1xf32>
    %cst_54 = arith.constant 3.200000e+01 : f32
    %152 = vector.broadcast %cst_54 : f32 to vector<16x1xf32>
    %153 = arith.divf %151, %152 : vector<16x1xf32>
    %154 = vector.broadcast %153 : vector<16x1xf32> to vector<16x32xf32>
    %155 = arith.subf %149, %154 : vector<16x32xf32>
    %156 = arith.mulf %155, %155 : vector<16x32xf32>
    %cst_55 = arith.constant dense<0.000000e+00> : vector<16xf32>
    %157 = vector.multi_reduction <add>, %156, %cst_55 [1] : vector<16x32xf32> to vector<16xf32>
    %158 = vector.shape_cast %157 : vector<16xf32> to vector<16x1xf32>
    %cst_56 = arith.constant 3.200000e+01 : f32
    %159 = vector.broadcast %cst_56 : f32 to vector<16x1xf32>
    %160 = arith.divf %158, %159 : vector<16x1xf32>
    %cst_57 = arith.constant 9.99999996E-13 : f32
    %161 = vector.broadcast %cst_57 : f32 to vector<16x1xf32>
    %162 = arith.addf %160, %161 : vector<16x1xf32>
    %163 = math.rsqrt %162 : vector<16x1xf32>
    %164 = vector.broadcast %163 : vector<16x1xf32> to vector<16x32xf32>
    %165 = arith.mulf %155, %164 : vector<16x32xf32>
    %166 = vector.broadcast %39 : vector<1x32xf32> to vector<16x32xf32>
    %167 = arith.mulf %165, %166 : vector<16x32xf32>
    %168 = vector.broadcast %40 : vector<1x32xf32> to vector<16x32xf32>
    %169 = arith.addf %167, %168 : vector<16x32xf32>
    %170 = arith.truncf %169 : vector<16x32xf32> to vector<16x32xbf16>
    %cst_58 = arith.constant dense<0.000000e+00> : vector<16x64xf32>
    %171 = tpu.matmul %170, %31, %cst_58 {dimension_numbers = #tpu.dot_dimension_numbers<[1], [0], [0], [1], [0, 0, 1, 1], [], []>} : vector<16x32xbf16>, vector<32x64xbf16>, vector<16x64xf32> -> vector<16x64xf32>
    %172 = vector.broadcast %33 : vector<1x64xf32> to vector<16x64xf32>
    %173 = arith.addf %171, %172 : vector<16x64xf32>
    %174 = arith.mulf %173, %173 : vector<16x64xf32>
    %175 = arith.mulf %173, %174 : vector<16x64xf32>
    %cst_59 = arith.constant 4.471500e-02 : f32
    %176 = vector.broadcast %cst_59 : f32 to vector<16x64xf32>
    %177 = arith.mulf %176, %175 : vector<16x64xf32>
    %178 = arith.addf %173, %177 : vector<16x64xf32>
    %cst_60 = arith.constant 0.797884583 : f32
    %179 = vector.broadcast %cst_60 : f32 to vector<16x64xf32>
    %180 = arith.mulf %179, %178 : vector<16x64xf32>
    %181 = math.tanh %180 : vector<16x64xf32>
    %cst_61 = arith.constant 1.000000e+00 : f32
    %182 = vector.broadcast %cst_61 : f32 to vector<16x64xf32>
    %183 = arith.addf %182, %181 : vector<16x64xf32>
    %cst_62 = arith.constant 5.000000e-01 : f32
    %184 = vector.broadcast %cst_62 : f32 to vector<16x64xf32>
    %185 = arith.mulf %184, %183 : vector<16x64xf32>
    %186 = arith.mulf %173, %185 : vector<16x64xf32>
    %187 = arith.truncf %186 : vector<16x64xf32> to vector<16x64xbf16>
    %cst_63 = arith.constant dense<0.000000e+00> : vector<16x32xf32>
    %188 = tpu.matmul %187, %35, %cst_63 {dimension_numbers = #tpu.dot_dimension_numbers<[1], [0], [0], [1], [0, 0, 1, 1], [], []>} : vector<16x64xbf16>, vector<64x32xbf16>, vector<16x32xf32> -> vector<16x32xf32>
    %189 = vector.broadcast %41 : vector<1x32xf32> to vector<16x32xf32>
    %190 = arith.addf %188, %189 : vector<16x32xf32>
    %191 = arith.addf %190, %169 : vector<16x32xf32>
    %cst_64 = arith.constant dense<0.000000e+00> : vector<16xf32>
    %192 = vector.multi_reduction <add>, %191, %cst_64 [1] : vector<16x32xf32> to vector<16xf32>
    %193 = vector.shape_cast %192 : vector<16xf32> to vector<16x1xf32>
    %cst_65 = arith.constant 3.200000e+01 : f32
    %194 = vector.broadcast %cst_65 : f32 to vector<16x1xf32>
    %195 = arith.divf %193, %194 : vector<16x1xf32>
    %196 = vector.broadcast %195 : vector<16x1xf32> to vector<16x32xf32>
    %197 = arith.subf %191, %196 : vector<16x32xf32>
    %198 = arith.mulf %197, %197 : vector<16x32xf32>
    %cst_66 = arith.constant dense<0.000000e+00> : vector<16xf32>
    %199 = vector.multi_reduction <add>, %198, %cst_66 [1] : vector<16x32xf32> to vector<16xf32>
    %200 = vector.shape_cast %199 : vector<16xf32> to vector<16x1xf32>
    %cst_67 = arith.constant 3.200000e+01 : f32
    %201 = vector.broadcast %cst_67 : f32 to vector<16x1xf32>
    %202 = arith.divf %200, %201 : vector<16x1xf32>
    %cst_68 = arith.constant 9.99999996E-13 : f32
    %203 = vector.broadcast %cst_68 : f32 to vector<16x1xf32>
    %204 = arith.addf %202, %203 : vector<16x1xf32>
    %205 = math.rsqrt %204 : vector<16x1xf32>
    %206 = vector.broadcast %205 : vector<16x1xf32> to vector<16x32xf32>
    %207 = arith.mulf %197, %206 : vector<16x32xf32>
    %208 = vector.broadcast %42 : vector<1x32xf32> to vector<16x32xf32>
    %209 = arith.mulf %207, %208 : vector<16x32xf32>
    %210 = vector.broadcast %43 : vector<1x32xf32> to vector<16x32xf32>
    %211 = arith.addf %209, %210 : vector<16x32xf32>
    %c1_69 = arith.constant 1 : index
    %c0_70 = arith.constant 0 : index
    %c0_71 = arith.constant 0 : index
    %212 = vector.load %arg3[%c1_69, %c0_70, %c0_71] : memref<2x32x96xbf16, #tpu.memory_space<vmem>>, vector<1x32x96xbf16>
    %213 = vector.shape_cast %212 : vector<1x32x96xbf16> to vector<32x96xbf16>
    %c1_72 = arith.constant 1 : index
    %c0_73 = arith.constant 0 : index
    %c0_74 = arith.constant 0 : index
    %214 = vector.load %arg4[%c1_72, %c0_73, %c0_74] : memref<2x1x96xf32, #tpu.memory_space<vmem>>, vector<1x1x96xf32>
    %215 = vector.shape_cast %214 : vector<1x1x96xf32> to vector<1x96xf32>
    %c1_75 = arith.constant 1 : index
    %c0_76 = arith.constant 0 : index
    %c0_77 = arith.constant 0 : index
    %216 = vector.load %arg5[%c1_75, %c0_76, %c0_77] : memref<2x32x32xbf16, #tpu.memory_space<vmem>>, vector<1x32x32xbf16>
    %217 = vector.shape_cast %216 : vector<1x32x32xbf16> to vector<32x32xbf16>
    %c1_78 = arith.constant 1 : index
    %c0_79 = arith.constant 0 : index
    %c0_80 = arith.constant 0 : index
    %218 = vector.load %arg6[%c1_78, %c0_79, %c0_80] : memref<2x32x64xbf16, #tpu.memory_space<vmem>>, vector<1x32x64xbf16>
    %219 = vector.shape_cast %218 : vector<1x32x64xbf16> to vector<32x64xbf16>
    %c1_81 = arith.constant 1 : index
    %c0_82 = arith.constant 0 : index
    %c0_83 = arith.constant 0 : index
    %220 = vector.load %arg7[%c1_81, %c0_82, %c0_83] : memref<2x1x64xf32, #tpu.memory_space<vmem>>, vector<1x1x64xf32>
    %221 = vector.shape_cast %220 : vector<1x1x64xf32> to vector<1x64xf32>
    %c1_84 = arith.constant 1 : index
    %c0_85 = arith.constant 0 : index
    %c0_86 = arith.constant 0 : index
    %222 = vector.load %arg8[%c1_84, %c0_85, %c0_86] : memref<2x64x32xbf16, #tpu.memory_space<vmem>>, vector<1x64x32xbf16>
    %223 = vector.shape_cast %222 : vector<1x64x32xbf16> to vector<64x32xbf16>
    %c1_87 = arith.constant 1 : index
    %c0_88 = arith.constant 0 : index
    %c0_89 = arith.constant 0 : index
    %224 = vector.load %arg9[%c1_87, %c0_88, %c0_89] : memref<2x6x32xf32, #tpu.memory_space<vmem>>, vector<1x6x32xf32>
    %225 = vector.shape_cast %224 : vector<1x6x32xf32> to vector<6x32xf32>
    %226 = vector.extract_strided_slice %225 {offsets = [0, 0], sizes = [1, 32], strides = [1, 1]} : vector<6x32xf32> to vector<1x32xf32>
    %227 = vector.extract_strided_slice %225 {offsets = [1, 0], sizes = [1, 32], strides = [1, 1]} : vector<6x32xf32> to vector<1x32xf32>
    %228 = vector.extract_strided_slice %225 {offsets = [2, 0], sizes = [1, 32], strides = [1, 1]} : vector<6x32xf32> to vector<1x32xf32>
    %229 = vector.extract_strided_slice %225 {offsets = [3, 0], sizes = [1, 32], strides = [1, 1]} : vector<6x32xf32> to vector<1x32xf32>
    %230 = vector.extract_strided_slice %225 {offsets = [4, 0], sizes = [1, 32], strides = [1, 1]} : vector<6x32xf32> to vector<1x32xf32>
    %231 = vector.extract_strided_slice %225 {offsets = [5, 0], sizes = [1, 32], strides = [1, 1]} : vector<6x32xf32> to vector<1x32xf32>
    %232 = arith.truncf %211 : vector<16x32xf32> to vector<16x32xbf16>
    %cst_90 = arith.constant dense<0.000000e+00> : vector<16x96xf32>
    %233 = tpu.matmul %232, %213, %cst_90 {dimension_numbers = #tpu.dot_dimension_numbers<[1], [0], [0], [1], [0, 0, 1, 1], [], []>} : vector<16x32xbf16>, vector<32x96xbf16>, vector<16x96xf32> -> vector<16x96xf32>
    %234 = vector.broadcast %215 : vector<1x96xf32> to vector<16x96xf32>
    %235 = arith.addf %233, %234 : vector<16x96xf32>
    %236 = vector.extract_strided_slice %23 {offsets = [0, 0], sizes = [1, 8], strides = [1, 1]} : vector<2x8xf32> to vector<1x8xf32>
    %237 = vector.extract_strided_slice %235 {offsets = [0, 0], sizes = [8, 16], strides = [1, 1]} : vector<16x96xf32> to vector<8x16xf32>
    %238 = vector.extract_strided_slice %235 {offsets = [0, 32], sizes = [8, 16], strides = [1, 1]} : vector<16x96xf32> to vector<8x16xf32>
    %239 = vector.extract_strided_slice %235 {offsets = [0, 64], sizes = [8, 16], strides = [1, 1]} : vector<16x96xf32> to vector<8x16xf32>
    %240 = arith.truncf %237 : vector<8x16xf32> to vector<8x16xbf16>
    %241 = arith.truncf %238 : vector<8x16xf32> to vector<8x16xbf16>
    %cst_91 = arith.constant dense<0.000000e+00> : vector<8x8xf32>
    %242 = tpu.matmul %240, %241, %cst_91 {dimension_numbers = #tpu.dot_dimension_numbers<[1], [1], [0], [0], [0, 0, 1, 0], [], []>} : vector<8x16xbf16>, vector<8x16xbf16>, vector<8x8xf32> -> vector<8x8xf32>
    %cst_92 = arith.constant 2.500000e-01 : f32
    %243 = vector.broadcast %cst_92 : f32 to vector<8x8xf32>
    %244 = arith.mulf %242, %243 : vector<8x8xf32>
    %245 = vector.broadcast %236 : vector<1x8xf32> to vector<8x8xf32>
    %246 = arith.addf %244, %245 : vector<8x8xf32>
    %cst_93 = arith.constant dense<0xFF800000> : vector<8xf32>
    %247 = vector.multi_reduction <maximumf>, %246, %cst_93 [1] : vector<8x8xf32> to vector<8xf32>
    %248 = vector.shape_cast %247 : vector<8xf32> to vector<8x1xf32>
    %249 = vector.broadcast %248 : vector<8x1xf32> to vector<8x8xf32>
    %250 = arith.subf %246, %249 : vector<8x8xf32>
    %251 = math.exp %250 : vector<8x8xf32>
    %cst_94 = arith.constant dense<0.000000e+00> : vector<8xf32>
    %252 = vector.multi_reduction <add>, %251, %cst_94 [1] : vector<8x8xf32> to vector<8xf32>
    %253 = vector.shape_cast %252 : vector<8xf32> to vector<8x1xf32>
    %254 = tpu.reciprocal %253 {approx = true} : vector<8x1xf32> -> vector<8x1xf32>
    %255 = vector.broadcast %254 : vector<8x1xf32> to vector<8x8xf32>
    %256 = arith.mulf %251, %255 : vector<8x8xf32>
    %257 = arith.truncf %256 : vector<8x8xf32> to vector<8x8xbf16>
    %258 = arith.truncf %239 : vector<8x16xf32> to vector<8x16xbf16>
    %cst_95 = arith.constant dense<0.000000e+00> : vector<8x16xf32>
    %259 = tpu.matmul %257, %258, %cst_95 {dimension_numbers = #tpu.dot_dimension_numbers<[1], [0], [0], [1], [0, 0, 1, 1], [], []>} : vector<8x8xbf16>, vector<8x16xbf16>, vector<8x16xf32> -> vector<8x16xf32>
    %260 = vector.extract_strided_slice %235 {offsets = [0, 16], sizes = [8, 16], strides = [1, 1]} : vector<16x96xf32> to vector<8x16xf32>
    %261 = vector.extract_strided_slice %235 {offsets = [0, 48], sizes = [8, 16], strides = [1, 1]} : vector<16x96xf32> to vector<8x16xf32>
    %262 = vector.extract_strided_slice %235 {offsets = [0, 80], sizes = [8, 16], strides = [1, 1]} : vector<16x96xf32> to vector<8x16xf32>
    %263 = arith.truncf %260 : vector<8x16xf32> to vector<8x16xbf16>
    %264 = arith.truncf %261 : vector<8x16xf32> to vector<8x16xbf16>
    %cst_96 = arith.constant dense<0.000000e+00> : vector<8x8xf32>
    %265 = tpu.matmul %263, %264, %cst_96 {dimension_numbers = #tpu.dot_dimension_numbers<[1], [1], [0], [0], [0, 0, 1, 0], [], []>} : vector<8x16xbf16>, vector<8x16xbf16>, vector<8x8xf32> -> vector<8x8xf32>
    %cst_97 = arith.constant 2.500000e-01 : f32
    %266 = vector.broadcast %cst_97 : f32 to vector<8x8xf32>
    %267 = arith.mulf %265, %266 : vector<8x8xf32>
    %268 = vector.broadcast %236 : vector<1x8xf32> to vector<8x8xf32>
    %269 = arith.addf %267, %268 : vector<8x8xf32>
    %cst_98 = arith.constant dense<0xFF800000> : vector<8xf32>
    %270 = vector.multi_reduction <maximumf>, %269, %cst_98 [1] : vector<8x8xf32> to vector<8xf32>
    %271 = vector.shape_cast %270 : vector<8xf32> to vector<8x1xf32>
    %272 = vector.broadcast %271 : vector<8x1xf32> to vector<8x8xf32>
    %273 = arith.subf %269, %272 : vector<8x8xf32>
    %274 = math.exp %273 : vector<8x8xf32>
    %cst_99 = arith.constant dense<0.000000e+00> : vector<8xf32>
    %275 = vector.multi_reduction <add>, %274, %cst_99 [1] : vector<8x8xf32> to vector<8xf32>
    %276 = vector.shape_cast %275 : vector<8xf32> to vector<8x1xf32>
    %277 = tpu.reciprocal %276 {approx = true} : vector<8x1xf32> -> vector<8x1xf32>
    %278 = vector.broadcast %277 : vector<8x1xf32> to vector<8x8xf32>
    %279 = arith.mulf %274, %278 : vector<8x8xf32>
    %280 = arith.truncf %279 : vector<8x8xf32> to vector<8x8xbf16>
    %281 = arith.truncf %262 : vector<8x16xf32> to vector<8x16xbf16>
    %cst_100 = arith.constant dense<0.000000e+00> : vector<8x16xf32>
    %282 = tpu.matmul %280, %281, %cst_100 {dimension_numbers = #tpu.dot_dimension_numbers<[1], [0], [0], [1], [0, 0, 1, 1], [], []>} : vector<8x8xbf16>, vector<8x16xbf16>, vector<8x16xf32> -> vector<8x16xf32>
    %283 = tpu.concatenate %259, %282 in 1 : vector<8x16xf32>, vector<8x16xf32> -> vector<8x32xf32>
    %284 = vector.extract_strided_slice %23 {offsets = [1, 0], sizes = [1, 8], strides = [1, 1]} : vector<2x8xf32> to vector<1x8xf32>
    %285 = vector.extract_strided_slice %235 {offsets = [8, 0], sizes = [8, 16], strides = [1, 1]} : vector<16x96xf32> to vector<8x16xf32>
    %286 = vector.extract_strided_slice %235 {offsets = [8, 32], sizes = [8, 16], strides = [1, 1]} : vector<16x96xf32> to vector<8x16xf32>
    %287 = vector.extract_strided_slice %235 {offsets = [8, 64], sizes = [8, 16], strides = [1, 1]} : vector<16x96xf32> to vector<8x16xf32>
    %288 = arith.truncf %285 : vector<8x16xf32> to vector<8x16xbf16>
    %289 = arith.truncf %286 : vector<8x16xf32> to vector<8x16xbf16>
    %cst_101 = arith.constant dense<0.000000e+00> : vector<8x8xf32>
    %290 = tpu.matmul %288, %289, %cst_101 {dimension_numbers = #tpu.dot_dimension_numbers<[1], [1], [0], [0], [0, 0, 1, 0], [], []>} : vector<8x16xbf16>, vector<8x16xbf16>, vector<8x8xf32> -> vector<8x8xf32>
    %cst_102 = arith.constant 2.500000e-01 : f32
    %291 = vector.broadcast %cst_102 : f32 to vector<8x8xf32>
    %292 = arith.mulf %290, %291 : vector<8x8xf32>
    %293 = vector.broadcast %284 : vector<1x8xf32> to vector<8x8xf32>
    %294 = arith.addf %292, %293 : vector<8x8xf32>
    %cst_103 = arith.constant dense<0xFF800000> : vector<8xf32>
    %295 = vector.multi_reduction <maximumf>, %294, %cst_103 [1] : vector<8x8xf32> to vector<8xf32>
    %296 = vector.shape_cast %295 : vector<8xf32> to vector<8x1xf32>
    %297 = vector.broadcast %296 : vector<8x1xf32> to vector<8x8xf32>
    %298 = arith.subf %294, %297 : vector<8x8xf32>
    %299 = math.exp %298 : vector<8x8xf32>
    %cst_104 = arith.constant dense<0.000000e+00> : vector<8xf32>
    %300 = vector.multi_reduction <add>, %299, %cst_104 [1] : vector<8x8xf32> to vector<8xf32>
    %301 = vector.shape_cast %300 : vector<8xf32> to vector<8x1xf32>
    %302 = tpu.reciprocal %301 {approx = true} : vector<8x1xf32> -> vector<8x1xf32>
    %303 = vector.broadcast %302 : vector<8x1xf32> to vector<8x8xf32>
    %304 = arith.mulf %299, %303 : vector<8x8xf32>
    %305 = arith.truncf %304 : vector<8x8xf32> to vector<8x8xbf16>
    %306 = arith.truncf %287 : vector<8x16xf32> to vector<8x16xbf16>
    %cst_105 = arith.constant dense<0.000000e+00> : vector<8x16xf32>
    %307 = tpu.matmul %305, %306, %cst_105 {dimension_numbers = #tpu.dot_dimension_numbers<[1], [0], [0], [1], [0, 0, 1, 1], [], []>} : vector<8x8xbf16>, vector<8x16xbf16>, vector<8x16xf32> -> vector<8x16xf32>
    %308 = vector.extract_strided_slice %235 {offsets = [8, 16], sizes = [8, 16], strides = [1, 1]} : vector<16x96xf32> to vector<8x16xf32>
    %309 = vector.extract_strided_slice %235 {offsets = [8, 48], sizes = [8, 16], strides = [1, 1]} : vector<16x96xf32> to vector<8x16xf32>
    %310 = vector.extract_strided_slice %235 {offsets = [8, 80], sizes = [8, 16], strides = [1, 1]} : vector<16x96xf32> to vector<8x16xf32>
    %311 = arith.truncf %308 : vector<8x16xf32> to vector<8x16xbf16>
    %312 = arith.truncf %309 : vector<8x16xf32> to vector<8x16xbf16>
    %cst_106 = arith.constant dense<0.000000e+00> : vector<8x8xf32>
    %313 = tpu.matmul %311, %312, %cst_106 {dimension_numbers = #tpu.dot_dimension_numbers<[1], [1], [0], [0], [0, 0, 1, 0], [], []>} : vector<8x16xbf16>, vector<8x16xbf16>, vector<8x8xf32> -> vector<8x8xf32>
    %cst_107 = arith.constant 2.500000e-01 : f32
    %314 = vector.broadcast %cst_107 : f32 to vector<8x8xf32>
    %315 = arith.mulf %313, %314 : vector<8x8xf32>
    %316 = vector.broadcast %284 : vector<1x8xf32> to vector<8x8xf32>
    %317 = arith.addf %315, %316 : vector<8x8xf32>
    %cst_108 = arith.constant dense<0xFF800000> : vector<8xf32>
    %318 = vector.multi_reduction <maximumf>, %317, %cst_108 [1] : vector<8x8xf32> to vector<8xf32>
    %319 = vector.shape_cast %318 : vector<8xf32> to vector<8x1xf32>
    %320 = vector.broadcast %319 : vector<8x1xf32> to vector<8x8xf32>
    %321 = arith.subf %317, %320 : vector<8x8xf32>
    %322 = math.exp %321 : vector<8x8xf32>
    %cst_109 = arith.constant dense<0.000000e+00> : vector<8xf32>
    %323 = vector.multi_reduction <add>, %322, %cst_109 [1] : vector<8x8xf32> to vector<8xf32>
    %324 = vector.shape_cast %323 : vector<8xf32> to vector<8x1xf32>
    %325 = tpu.reciprocal %324 {approx = true} : vector<8x1xf32> -> vector<8x1xf32>
    %326 = vector.broadcast %325 : vector<8x1xf32> to vector<8x8xf32>
    %327 = arith.mulf %322, %326 : vector<8x8xf32>
    %328 = arith.truncf %327 : vector<8x8xf32> to vector<8x8xbf16>
    %329 = arith.truncf %310 : vector<8x16xf32> to vector<8x16xbf16>
    %cst_110 = arith.constant dense<0.000000e+00> : vector<8x16xf32>
    %330 = tpu.matmul %328, %329, %cst_110 {dimension_numbers = #tpu.dot_dimension_numbers<[1], [0], [0], [1], [0, 0, 1, 1], [], []>} : vector<8x8xbf16>, vector<8x16xbf16>, vector<8x16xf32> -> vector<8x16xf32>
    %331 = tpu.concatenate %307, %330 in 1 : vector<8x16xf32>, vector<8x16xf32> -> vector<8x32xf32>
    %332 = tpu.concatenate %283, %331 in 0 : vector<8x32xf32>, vector<8x32xf32> -> vector<16x32xf32>
    %333 = arith.truncf %332 : vector<16x32xf32> to vector<16x32xbf16>
    %cst_111 = arith.constant dense<0.000000e+00> : vector<16x32xf32>
    %334 = tpu.matmul %333, %217, %cst_111 {dimension_numbers = #tpu.dot_dimension_numbers<[1], [0], [0], [1], [0, 0, 1, 1], [], []>} : vector<16x32xbf16>, vector<32x32xbf16>, vector<16x32xf32> -> vector<16x32xf32>
    %335 = vector.broadcast %226 : vector<1x32xf32> to vector<16x32xf32>
    %336 = arith.addf %334, %335 : vector<16x32xf32>
    %337 = arith.addf %336, %211 : vector<16x32xf32>
    %cst_112 = arith.constant dense<0.000000e+00> : vector<16xf32>
    %338 = vector.multi_reduction <add>, %337, %cst_112 [1] : vector<16x32xf32> to vector<16xf32>
    %339 = vector.shape_cast %338 : vector<16xf32> to vector<16x1xf32>
    %cst_113 = arith.constant 3.200000e+01 : f32
    %340 = vector.broadcast %cst_113 : f32 to vector<16x1xf32>
    %341 = arith.divf %339, %340 : vector<16x1xf32>
    %342 = vector.broadcast %341 : vector<16x1xf32> to vector<16x32xf32>
    %343 = arith.subf %337, %342 : vector<16x32xf32>
    %344 = arith.mulf %343, %343 : vector<16x32xf32>
    %cst_114 = arith.constant dense<0.000000e+00> : vector<16xf32>
    %345 = vector.multi_reduction <add>, %344, %cst_114 [1] : vector<16x32xf32> to vector<16xf32>
    %346 = vector.shape_cast %345 : vector<16xf32> to vector<16x1xf32>
    %cst_115 = arith.constant 3.200000e+01 : f32
    %347 = vector.broadcast %cst_115 : f32 to vector<16x1xf32>
    %348 = arith.divf %346, %347 : vector<16x1xf32>
    %cst_116 = arith.constant 9.99999996E-13 : f32
    %349 = vector.broadcast %cst_116 : f32 to vector<16x1xf32>
    %350 = arith.addf %348, %349 : vector<16x1xf32>
    %351 = math.rsqrt %350 : vector<16x1xf32>
    %352 = vector.broadcast %351 : vector<16x1xf32> to vector<16x32xf32>
    %353 = arith.mulf %343, %352 : vector<16x32xf32>
    %354 = vector.broadcast %227 : vector<1x32xf32> to vector<16x32xf32>
    %355 = arith.mulf %353, %354 : vector<16x32xf32>
    %356 = vector.broadcast %228 : vector<1x32xf32> to vector<16x32xf32>
    %357 = arith.addf %355, %356 : vector<16x32xf32>
    %358 = arith.truncf %357 : vector<16x32xf32> to vector<16x32xbf16>
    %cst_117 = arith.constant dense<0.000000e+00> : vector<16x64xf32>
    %359 = tpu.matmul %358, %219, %cst_117 {dimension_numbers = #tpu.dot_dimension_numbers<[1], [0], [0], [1], [0, 0, 1, 1], [], []>} : vector<16x32xbf16>, vector<32x64xbf16>, vector<16x64xf32> -> vector<16x64xf32>
    %360 = vector.broadcast %221 : vector<1x64xf32> to vector<16x64xf32>
    %361 = arith.addf %359, %360 : vector<16x64xf32>
    %362 = arith.mulf %361, %361 : vector<16x64xf32>
    %363 = arith.mulf %361, %362 : vector<16x64xf32>
    %cst_118 = arith.constant 4.471500e-02 : f32
    %364 = vector.broadcast %cst_118 : f32 to vector<16x64xf32>
    %365 = arith.mulf %364, %363 : vector<16x64xf32>
    %366 = arith.addf %361, %365 : vector<16x64xf32>
    %cst_119 = arith.constant 0.797884583 : f32
    %367 = vector.broadcast %cst_119 : f32 to vector<16x64xf32>
    %368 = arith.mulf %367, %366 : vector<16x64xf32>
    %369 = math.tanh %368 : vector<16x64xf32>
    %cst_120 = arith.constant 1.000000e+00 : f32
    %370 = vector.broadcast %cst_120 : f32 to vector<16x64xf32>
    %371 = arith.addf %370, %369 : vector<16x64xf32>
    %cst_121 = arith.constant 5.000000e-01 : f32
    %372 = vector.broadcast %cst_121 : f32 to vector<16x64xf32>
    %373 = arith.mulf %372, %371 : vector<16x64xf32>
    %374 = arith.mulf %361, %373 : vector<16x64xf32>
    %375 = arith.truncf %374 : vector<16x64xf32> to vector<16x64xbf16>
    %cst_122 = arith.constant dense<0.000000e+00> : vector<16x32xf32>
    %376 = tpu.matmul %375, %223, %cst_122 {dimension_numbers = #tpu.dot_dimension_numbers<[1], [0], [0], [1], [0, 0, 1, 1], [], []>} : vector<16x64xbf16>, vector<64x32xbf16>, vector<16x32xf32> -> vector<16x32xf32>
    %377 = vector.broadcast %229 : vector<1x32xf32> to vector<16x32xf32>
    %378 = arith.addf %376, %377 : vector<16x32xf32>
    %379 = arith.addf %378, %357 : vector<16x32xf32>
    %cst_123 = arith.constant dense<0.000000e+00> : vector<16xf32>
    %380 = vector.multi_reduction <add>, %379, %cst_123 [1] : vector<16x32xf32> to vector<16xf32>
    %381 = vector.shape_cast %380 : vector<16xf32> to vector<16x1xf32>
    %cst_124 = arith.constant 3.200000e+01 : f32
    %382 = vector.broadcast %cst_124 : f32 to vector<16x1xf32>
    %383 = arith.divf %381, %382 : vector<16x1xf32>
    %384 = vector.broadcast %383 : vector<16x1xf32> to vector<16x32xf32>
    %385 = arith.subf %379, %384 : vector<16x32xf32>
    %386 = arith.mulf %385, %385 : vector<16x32xf32>
    %cst_125 = arith.constant dense<0.000000e+00> : vector<16xf32>
    %387 = vector.multi_reduction <add>, %386, %cst_125 [1] : vector<16x32xf32> to vector<16xf32>
    %388 = vector.shape_cast %387 : vector<16xf32> to vector<16x1xf32>
    %cst_126 = arith.constant 3.200000e+01 : f32
    %389 = vector.broadcast %cst_126 : f32 to vector<16x1xf32>
    %390 = arith.divf %388, %389 : vector<16x1xf32>
    %cst_127 = arith.constant 9.99999996E-13 : f32
    %391 = vector.broadcast %cst_127 : f32 to vector<16x1xf32>
    %392 = arith.addf %390, %391 : vector<16x1xf32>
    %393 = math.rsqrt %392 : vector<16x1xf32>
    %394 = vector.broadcast %393 : vector<16x1xf32> to vector<16x32xf32>
    %395 = arith.mulf %385, %394 : vector<16x32xf32>
    %396 = vector.broadcast %230 : vector<1x32xf32> to vector<16x32xf32>
    %397 = arith.mulf %395, %396 : vector<16x32xf32>
    %398 = vector.broadcast %231 : vector<1x32xf32> to vector<16x32xf32>
    %399 = arith.addf %397, %398 : vector<16x32xf32>
    %400 = vector.extract_strided_slice %399 {offsets = [0, 0], sizes = [1, 32], strides = [1, 1]} : vector<16x32xf32> to vector<1x32xf32>
    %401 = vector.extract_strided_slice %399 {offsets = [8, 0], sizes = [1, 32], strides = [1, 1]} : vector<16x32xf32> to vector<1x32xf32>
    %402 = tpu.concatenate %400, %401 in 0 : vector<1x32xf32>, vector<1x32xf32> -> vector<2x32xf32>
    %403 = arith.truncf %402 : vector<2x32xf32> to vector<2x32xbf16>
    %c0_128 = arith.constant 0 : index
    %c0_129 = arith.constant 0 : index
    %404 = vector.load %arg10[%c0_128, %c0_129] : memref<32x32xbf16, #tpu.memory_space<vmem>>, vector<32x32xbf16>
    %cst_130 = arith.constant dense<0.000000e+00> : vector<2x32xf32>
    %405 = tpu.matmul %403, %404, %cst_130 {dimension_numbers = #tpu.dot_dimension_numbers<[1], [0], [0], [1], [0, 0, 1, 1], [], []>} : vector<2x32xbf16>, vector<32x32xbf16>, vector<2x32xf32> -> vector<2x32xf32>
    %c0_131 = arith.constant 0 : index
    %c0_132 = arith.constant 0 : index
    %406 = vector.load %arg11[%c0_131, %c0_132] : memref<1x32xf32, #tpu.memory_space<vmem>>, vector<1x32xf32>
    %407 = vector.broadcast %406 : vector<1x32xf32> to vector<2x32xf32>
    %408 = arith.addf %405, %407 : vector<2x32xf32>
    %409 = math.tanh %408 : vector<2x32xf32>
    %410 = arith.truncf %409 : vector<2x32xf32> to vector<2x32xbf16>
    %c0_133 = arith.constant 0 : index
    %c0_134 = arith.constant 0 : index
    %411 = vector.load %arg12[%c0_133, %c0_134] : memref<32x16xbf16, #tpu.memory_space<vmem>>, vector<32x16xbf16>
    %cst_135 = arith.constant dense<0.000000e+00> : vector<2x16xf32>
    %412 = tpu.matmul %410, %411, %cst_135 {dimension_numbers = #tpu.dot_dimension_numbers<[1], [0], [0], [1], [0, 0, 1, 1], [], []>} : vector<2x32xbf16>, vector<32x16xbf16>, vector<2x16xf32> -> vector<2x16xf32>
    %c0_136 = arith.constant 0 : index
    %c0_137 = arith.constant 0 : index
    %413 = vector.load %arg13[%c0_136, %c0_137] : memref<1x16xf32, #tpu.memory_space<vmem>>, vector<1x16xf32>
    %414 = vector.broadcast %413 : vector<1x16xf32> to vector<2x16xf32>
    %415 = arith.addf %412, %414 : vector<2x16xf32>
    %c0_138 = arith.constant 0 : index
    %c0_139 = arith.constant 0 : index
    %416 = vector.load %arg14[%c0_138, %c0_139] : memref<2x16xf32, #tpu.memory_space<vmem>>, vector<2x16xf32>
    tpu.vector_store %arg14[%c0_138, %c0_139], %415 {strides = array<i32>} : memref<2x16xf32, #tpu.memory_space<vmem>>, vector<2x16xf32>,
    return
  }
}

</mosaic_0001>

<bundles_post_ra>
// kernel: text_relevance_forward.1
= control target key start
LH: loop header
LB: loop body
LE: loop exit
PB: predicated region body
PF: predicated region fallthrough
CT: control target
= control target key end

     0   :  { %vm53_vm0 = vcmask 261120   ;;  %s2909_s0 = inlined_call_operand.vmem [shape: f32[16,32], index: 0, kind: input, shape index: {}]   ;;  %s2910_s1 = inlined_call_operand.vmem [shape: f32[2,8], index: 1, kind: input, shape index: {}]   ;;  %s2911_s2 = inlined_call_operand.vmem [shape: f32[2,32], index: 2, kind: input, shape index: {}]   ;;  %s2912_s3 = inlined_call_operand.vmem [shape: bf16[2,32,96], index: 3, kind: input, shape index: {}]   ;;  %s2913_s4 = inlined_call_operand.vmem [shape: f32[2,1,96], index: 4, kind: input, shape index: {}]   ;;  %s2914_s5 = inlined_call_operand.vmem [shape: bf16[2,32,32], index: 5, kind: input, shape index: {}]   ;;  %s2915_s6 = inlined_call_operand.vmem [shape: bf16[2,32,64], index: 6, kind: input, shape index: {}]   ;;  %s2916_s7 = inlined_call_operand.vmem [shape: f32[2,1,64], index: 7, kind: input, shape index: {}]   ;;  %s2917_s8 = inlined_call_operand.vmem [shape: bf16[2,64,32], index: 8, kind: input, shape index: {}]   ;;  %s2918_s9 = inlined_call_operand.vmem [shape: f32[2,6,32], index: 9, kind: input, shape index: {}]   ;;  %s2919_s10 = inlined_call_operand.vmem [shape: bf16[32,32], index: 10, kind: input, shape index: {}]   ;;  %s2920_s11 = inlined_call_operand.vmem [shape: f32[1,32], index: 11, kind: input, shape index: {}]   ;;  %s2921_s12 = inlined_call_operand.vmem [shape: bf16[32,16], index: 12, kind: input, shape index: {}]   ;;  %s2922_s13 = inlined_call_operand.vmem [shape: f32[1,16], index: 13, kind: input, shape index: {}]   ;;  %s2923_s14 = inlined_call_operand.hbm [shape: f32[2,16], index: 14, kind: output, shape index: {}]  }
   0x1   :  { %v49_v0 = vld [vmem:[%s2909_s0] sm:$0xff]  ;;  %v50_v1 = vld [vmem:[%s2909_s0 + $0x8] sm:$0xff] }
   0x2   :  { %v54_v2 = vsel %vm53_vm0, %v49_v0, 0.0  ;;  %v57_v3 = vsel %vm53_vm0, %v50_v1, 0.0 }
   0x3   :  { %55 = vadd.xlane.f32.xlu0 %v54_v2 }
   0x7   :  { %58 = vadd.xlane.f32.xlu0 %v57_v3 }
   0x8   :  { %19 = vsyncpa [#allocation3], 0  ;;  %v2297_v14 = vld [vmem:[%s2912_s3 + $0x8] sm:$0xff]   ;;  %v2405_v15 = vmov 0.0   ;;  %vm2406_vm1 = vmmov 0   ;;  %v2298_v16 = vld [vmem:[%s2912_s3] sm:$0xff]   ;;  %v232_v53 = vlaneseq }
   0x9   :  { %2094 = vmatprep.subr.bf16.mxu0 %v2405_v15  ;;  %2098 = vmatprep.mubr.msk.bf16.mxu0 %vm2406_vm1, %v2405_v15  ;;  %v1947_v25 = vld [vmem:[%s2911_s2] ss:$0 sm:$0xff]  ;;  %v1948_v29 = vld [vmem:[%s2911_s2 + $0x1] ss:$0 sm:$0xff]  ;;  %s2407_s2 = smov 80   ;;  %s2408_s26 = smov 96  }
   0xa   :  { %2095 = vmatpush3.bf16.msra.mxu0 %v2297_v14  ;;  %2102 = vmatprep.subr.bf16.mxu1 %v2405_v15  ;;  %v1949_v34 = vld [vmem:[%s2913_s4] ss:$0 sm:$0xff]  ;;  %s2409_s27 = smov 112   ;;  %vm184_vm2 = vcmask 130048   ;;  %v2569_v54 = vshrl.u32 %v232_v53, 7  ;;  %vm237_vm3 = vcmask 64512  }
   0xb   :  { %2096 = vmatprep.subr.bf16.mxu0 %v2405_v15  ;;  %2104 = vmatprep.mubr.msk.bf16.mxu1 %vm2406_vm1, %v2405_v15  ;;  %v93_v56 = vld [vmem:[%s2910_s1] sm:$0x3]  ;;  %s2410_s1 = smov 48   ;;  %s2411_s30 = smov 64   ;;  %vm255_vm4 = vcmask 1043456   ;;  %vm860_vm5 = vcmask 523264  }
   0xc   :  { %v2572_v55 = vsub.s32 0, %v2569_v54  ;;  %s2412_s18 = smov 16   ;;  %vm1794_vm6 = vcmask 1040384   ;;  %vm1931_vm7 = vcmask 123904  }
   0xe   :  { %2097 = vmatpush3.bf16.msra.mxu0 %v2298_v16  ;;  %v2578_v57 = vrot.slane %v93_v56, %v2572_v55 }
   0xf   :  { %2108 = vmatprep.subr.bf16.mxu0 %v2405_v15 }
  0x8c   :  { %v56_v4 = vpop.xlane.xlu0 %55 }
  0x8d   :  { %v61_v5 = vmul.f32 0.03125, %v56_v4 }
  0x8f   :  { %v63_v6 = vsub.f32 %v49_v0, %v61_v5  ;;  %v2584_v5 = vsub.s32 1, %v2569_v54 }
  0x90   :  { %v59_v7 = vpop.xlane.xlu0 %58 }
  0x91   :  { %v62_v8 = vmul.f32 0.03125, %v59_v7  ;;  %v65_v9 = vmul.f32 %v63_v6, %v63_v6 }
  0x93   :  { %v64_v10 = vsub.f32 %v50_v1, %v62_v8  ;;  %v67_v11 = vsel %vm53_vm0, %v65_v9, 0.0  ;;  %v2588_v9 = vrot.slane %v93_v56, %v2584_v5 }
  0x94   :  { %68 = vadd.xlane.f32.xlu1 %v67_v11 }
  0x95   :  { %v66_v12 = vmul.f32 %v64_v10, %v64_v10 }
  0x97   :  { %v70_v13 = vsel %vm53_vm0, %v66_v12, 0.0 }
  0x98   :  { %71 = vadd.xlane.f32.xlu1 %v70_v13 }
 0x11d   :  { %v69_v17 = vpop.xlane.xlu1 %68 }
 0x11e   :  { %v73_v18 = vmul.f32 0.03125, %v69_v17 }
 0x120   :  { %v75_v19 = vadd.f32 1e-12, %v73_v18 }
 0x121   :  { %v72_v20 = vpop.xlane.xlu1 %71 }
 0x122   :  { %2321 = vrsqrt.f32 %v75_v19  ;;  %v74_v21 = vmul.f32 0.03125, %v72_v20 }
 0x124   :  { %v76_v22 = vadd.f32 1e-12, %v74_v21 }
 0x126   :  { %2323 = vrsqrt.f32 %v76_v22 }
 0x12f   :  { %v2322_v23 = vpop.eup %2321 }
 0x130   :  { %v79_v24 = vmul.f32 %v2322_v23, %v63_v6 }
 0x132   :  { %v85_v28 = vmul.f32 %v1947_v25, %v79_v24 }
 0x133   :  { %v2324_v26 = vpop.eup %2323 }
 0x134   :  { %v80_v27 = vmul.f32 %v2324_v26, %v64_v10  ;;  %v2519_v31 = vadd.f32 %v1948_v29, %v85_v28 }
 0x136   :  { %v86_v30 = vmul.f32 %v1947_v25, %v80_v27 }
 0x138   :  { %v2521_v32 = vadd.f32 %v1948_v29, %v86_v30 }
 0x13a   :  { %v117_v33 = vpack.c.bf16 %v2521_v32, %v2519_v31 }
 0x13c   :  { %2099 = vmatmul.mubr.msk.bf16.vlgmr.msra.gmra.mxu0 %vm53_vm0, %v117_v33 }
 0x13d   :  { %2110 = vmatprep.mubr.msk.bf16.mxu0 %vm2406_vm1, %v2405_v15 }
 0x1fc   :  { %v173_v35 = vpop.f32.mrf.mxu0 }
 0x1fd   :  { %v174_v36 = vadd.f32 %v1949_v34, %v173_v35 }
 0x1fe   :  { %v2100_v37 = vpop.f32.mrf.mxu0 }
 0x1ff   :  { %v2531_v38 = vpack.c.bf16 %v174_v36, %v174_v36 }
 0x200   :  { %v176_v39 = vpop.f32.mrf.mxu0 }
 0x201   :  { %v177_v40 = vadd.f32 %v1949_v34, %v176_v39  ;;  %301 = vrot.lane.b32.xlu1 %v2531_v38, %s2407_s2  ;;  %182 = vrot.lane.b32.xlu0 %v2531_v38, %s2408_s26 }
 0x202   :  { %v2101_v41 = vpop.f32.mrf.mxu0 }
 0x203   :  { %v2537_v42 = vpack.c.bf16 %v177_v40, %v177_v40 }
 0x205   :  { %299 = vrot.lane.b32.xlu1 %v2531_v38, %s2409_s27  ;;  %534 = vrot.lane.b32.xlu0 %v2537_v42, %s2407_s2 }
 0x209   :  { %418 = vrot.lane.b32.xlu1 %v2537_v42, %s2408_s26 }
 0x20d   :  { %532 = vrot.lane.b32.xlu1 %v2537_v42, %s2409_s27 }
 0x273   :  { %v183_v43 = vpop.permute.xlu0 %182  ;;  %v302_v45 = vpop.permute.xlu1 %301 }
 0x274   :  { %v189_v44 = vsel %vm184_vm2, %v183_v43, 0  ;;  %v307_v47 = vsel %vm184_vm2, %v302_v45, 0 }
 0x275   :  { %2103 = vmatpush3.bf16.xpose.msra.mxu1 %v189_v44 }
 0x276   :  { %2114 = vmatprep.subr.bf16.mxu1 %v2405_v15 }
 0x277   :  { %v300_v46 = vpop.permute.xlu1 %299  ;;  %v535_v50 = vpop.permute.xlu0 %534 }
 0x278   :  { %v540_v51 = vsel %vm184_vm2, %v535_v50, 0 }
 0x27b   :  { %v419_v48 = vpop.permute.xlu1 %418 }
 0x27c   :  { %2105 = vmatmul.mubr.msk.bf16.vlgmr.msra.gmra.mxu1 %vm184_vm2, %v2531_v38  ;;  %v424_v49 = vsel %vm184_vm2, %v419_v48, 0 }
 0x27d   :  { %2115 = vmatpush3.bf16.xpose.msra.mxu1 %v307_v47  ;;  %2116 = vmatprep.mubr.msk.bf16.mxu1 %vm2406_vm1, %v2405_v15 }
 0x27e   :  { %2126 = vmatprep.subr.bf16.mxu1 %v2405_v15 }
 0x27f   :  { %v533_v52 = vpop.permute.xlu1 %532 }
 0x284   :  { %2117 = vmatmul.mubr.msk.bf16.vlgmr.msra.gmra.mxu1 %vm184_vm2, %v300_v46 }
 0x285   :  { %2127 = vmatpush3.bf16.xpose.msra.mxu1 %v424_v49  ;;  %2128 = vmatprep.mubr.msk.bf16.mxu1 %vm2406_vm1, %v2405_v15 }
 0x286   :  { %2138 = vmatprep.subr.bf16.mxu1 %v2405_v15 }
 0x28c   :  { %2129 = vmatmul.mubr.msk.bf16.vlgmr.msra.gmra.mxu1 %vm184_vm2, %v2537_v42 }
 0x28d   :  { %2139 = vmatpush3.bf16.xpose.msra.mxu1 %v540_v51  ;;  %2140 = vmatprep.mubr.msk.bf16.mxu1 %vm2406_vm1, %v2405_v15 }
 0x28e   :  { %2150 = vmatprep.subr.bf16.mxu1 %v2405_v15 }
 0x294   :  { %2141 = vmatmul.mubr.msk.bf16.vlgmr.msra.gmra.mxu1 %vm184_vm2, %v533_v52 }
 0x295   :  { %2154 = vmatprep.mubr.msk.bf16.mxu1 %vm2406_vm1, %v2405_v15 }
 0x33c   :  { %v225_v58 = vpop.f32.mrf.mxu1 }
 0x33d   :  { %v231_v59 = vmul.f32 0.25, %v225_v58 }
 0x33e   :  { %v2106_v60 = vpop.f32.mrf.mxu1 }
 0x33f   :  { %v236_v61 = vadd.f32 %v2578_v57, %v231_v59 }
 0x340   :  { %v228_v62 = vpop.f32.mrf.mxu1 }
 0x341   :  { %v238_v63 = vsel %vm237_vm3, %v236_v61, -inf }
 0x342   :  { %v2107_v0 = vpop.f32.mrf.mxu1  ;;  %239 = vmax.xlane.f32.xlu0 %v238_v63 }
 0x344   :  { %v343_v1 = vpop.f32.mrf.mxu1 }
 0x345   :  { %v349_v2 = vmul.f32 0.25, %v343_v1 }
 0x346   :  { %v2118_v3 = vpop.f32.mrf.mxu1 }
 0x347   :  { %v350_v4 = vadd.f32 %v349_v2, %v2578_v57 }
 0x348   :  { %v346_v6 = vpop.f32.mrf.mxu1 }
 0x349   :  { %v351_v7 = vsel %vm237_vm3, %v350_v4, -inf }
 0x34a   :  { %v2119_v8 = vpop.f32.mrf.mxu1  ;;  %352 = vmax.xlane.f32.xlu1 %v351_v7 }
 0x34c   :  { %v460_v10 = vpop.f32.mrf.mxu1 }
 0x34d   :  { %v466_v11 = vmul.f32 0.25, %v460_v10 }
 0x34e   :  { %v2130_v12 = vpop.f32.mrf.mxu1 }
 0x34f   :  { %v471_v13 = vadd.f32 %v2588_v9, %v466_v11  ;;  %v2299_v12 = vld [vmem:[%s2914_s5 + $0x8] sm:$0xff]  }
 0x350   :  { %v463_v14 = vpop.f32.mrf.mxu1  ;;  %2151 = vmatpush3.bf16.msra.mxu1 %v2299_v12  ;;  %v746_v12 = vsub.s32 2, %v2569_v54 }
 0x351   :  { %v472_v16 = vsel %vm237_vm3, %v471_v13, -inf  ;;  %2152 = vmatprep.subr.bf16.mxu1 %v2405_v15 }
 0x352   :  { %473 = vmax.xlane.f32.xlu0 %v472_v16  ;;  %v2131_v17 = vpop.f32.mrf.mxu1 }
 0x354   :  { %v576_v18 = vpop.f32.mrf.mxu1 }
 0x355   :  { %v582_v19 = vmul.f32 0.25, %v576_v18 }
 0x356   :  { %v2142_v20 = vpop.f32.mrf.mxu1 }
 0x357   :  { %v583_v21 = vadd.f32 %v582_v19, %v2588_v9 }
 0x358   :  { %v579_v22 = vpop.f32.mrf.mxu1 }
 0x359   :  { %v584_v23 = vsel %vm237_vm3, %v583_v21, -inf }
 0x35a   :  { %585 = vmax.xlane.f32.xlu0 %v584_v23  ;;  %v2143_v24 = vpop.f32.mrf.mxu1 }
 0x3cb   :  { %v240_v25 = vpop.xlane.xlu0 %239 }
 0x3cc   :  { %v241_v26 = vsub.f32 %v236_v61, %v240_v25 }
 0x3ce   :  { %v242_v27 = vmul.f32 1.442695, %v241_v26  ;;  %v2300_v26 = vld [vmem:[%s2914_s5] sm:$0xff]  }
 0x3cf   :  { %2153 = vmatpush3.bf16.msra.mxu1 %v2300_v26  ;;  %v1964_v26 = vld [vmem:[%s2916_s7] ss:$0 sm:$0xff] }
 0x3d0   :  { %2325 = vpow2.f32 %v242_v27  ;;  %2166 = vmatprep.subr.bf16.mxu1 %v2405_v15 }
 0x3d3   :  { %v353_v28 = vpop.xlane.xlu1 %352 }
 0x3d4   :  { %v354_v29 = vsub.f32 %v350_v4, %v353_v28 }
 0x3d6   :  { %v355_v30 = vmul.f32 1.442695, %v354_v29 }
 0x3d8   :  { %2327 = vpow2.f32 %v355_v30 }
 0x3db   :  { %v474_v33 = vpop.xlane.xlu0 %473 }
 0x3dc   :  { %v475_v34 = vsub.f32 %v471_v13, %v474_v33 }
 0x3dd   :  { %v2326_v35 = vpop.eup %2325 }
 0x3de   :  { %v476_v36 = vmul.f32 1.442695, %v475_v34  ;;  %v244_v37 = vsel %vm237_vm3, %v2326_v35, 0.0 }
 0x3df   :  { %245 = vadd.xlane.f32.xlu0 %v244_v37 }
 0x3e0   :  { %2329 = vpow2.f32 %v476_v36 }
 0x3e3   :  { %v586_v44 = vpop.xlane.xlu0 %585 }
 0x3e4   :  { %v587_v45 = vsub.f32 %v583_v21, %v586_v44 }
 0x3e5   :  { %v2328_v39 = vpop.eup %2327 }
 0x3e6   :  { %v357_v40 = vsel %vm237_vm3, %v2328_v39, 0.0  ;;  %v588_v46 = vmul.f32 1.442695, %v587_v45 }
 0x3e7   :  { %358 = vadd.xlane.f32.xlu1 %v357_v40 }
 0x3e8   :  { %2331 = vpow2.f32 %v588_v46 }
 0x3ed   :  { %v2330_v41 = vpop.eup %2329 }
 0x3ee   :  { %v478_v43 = vsel %vm237_vm3, %v2330_v41, 0.0 }
 0x3ef   :  { %479 = vadd.xlane.f32.xlu0 %v478_v43 }
 0x3f5   :  { %v2332_v47 = vpop.eup %2331 }
 0x3f6   :  { %v590_v48 = vsel %vm237_vm3, %v2332_v47, 0.0 }
 0x3f8   :  { %363 = vrot.lane.b32.xlu1 %v2531_v38, %s2410_s1 }
 0x3fc   :  { %484 = vrot.lane.b32.xlu1 %v2537_v42, %s2411_s30 }
 0x405   :  { %250 = vrot.lane.b32.xlu0 %v2531_v38, %s2411_s30 }
 0x420   :  { %591 = vadd.xlane.f32.xlu1 %v590_v48 }
 0x431   :  { %596 = vrot.lane.b32.xlu1 %v2537_v42, %s2410_s1 }
 0x468   :  { %v246_v49 = vpop.xlane.xlu0 %245 }
 0x469   :  { %2333 = vrcp.f32 %v246_v49 }
 0x470   :  { %v359_v50 = vpop.xlane.xlu1 %358 }
 0x471   :  { %2335 = vrcp.f32 %v359_v50 }
 0x474   :  { %v364_v58 = vpop.permute.xlu1 %363 }
 0x475   :  { %v369_v42 = vsel %vm255_vm4, %v364_v58, 0 }
 0x476   :  { %v2334_v51 = vpop.eup %2333 }
 0x477   :  { %v248_v53 = vmul.f32 %v2334_v51, %v2326_v35 }
 0x478   :  { %v480_v52 = vpop.xlane.xlu0 %479  ;;  %v485_v62 = vpop.permute.xlu1 %484 }
 0x479   :  { %2337 = vrcp.f32 %v480_v52  ;;  %v249_v59 = vpack.c.bf16 %v248_v53, %v248_v53  ;;  %v490_v1 = vsel %vm255_vm4, %v485_v62, 0 }
 0x47c   :  { %v251_v38 = vpop.permute.xlu0 %250 }
 0x47d   :  { %v257_v56 = vsel %vm255_vm4, %v251_v38, 0 }
 0x47e   :  { %2109 = vmatpush3.bf16.msra.mxu0 %v257_v56  ;;  %v2336_v60 = vpop.eup %2335 }
 0x47f   :  { %2120 = vmatprep.subr.bf16.mxu0 %v2405_v15  ;;  %v361_v61 = vmul.f32 %v2336_v60, %v2328_v39 }
 0x481   :  { %2111 = vmatmul.mubr.msk.bf16.vlgmr.msra.gmra.mxu0 %vm237_vm3, %v249_v59  ;;  %v362_v63 = vpack.c.bf16 %v361_v61, %v361_v61 }
 0x482   :  { %2121 = vmatpush3.bf16.msra.mxu0 %v369_v42  ;;  %2122 = vmatprep.mubr.msk.bf16.mxu0 %vm2406_vm1, %v2405_v15 }
 0x483   :  { %2132 = vmatprep.subr.bf16.mxu0 %v2405_v15 }
 0x486   :  { %v2338_v0 = vpop.eup %2337 }
 0x487   :  { %v482_v2 = vmul.f32 %v2338_v0, %v2330_v41  ;;  %v2643_v41 = vld [vmem:[%s2918_s9] sm:$0x3f] }
 0x488   :  { %v653_v43 = vrot.slane %v2643_v41, %v2572_v55  ;;  %v2302_v0 = vld [vmem:[%s2915_s6] sm:$0xff]  }
 0x489   :  { %2123 = vmatmul.mubr.msk.bf16.vlgmr.msra.gmra.mxu0 %vm237_vm3, %v362_v63  ;;  %v483_v3 = vpack.c.bf16 %v482_v2, %v482_v2 }
 0x48a   :  { %2133 = vmatpush3.bf16.msra.mxu0 %v490_v1  ;;  %2134 = vmatprep.mubr.msk.bf16.mxu0 %vm2406_vm1, %v2405_v15 }
 0x48b   :  { %2144 = vmatprep.subr.bf16.mxu0 %v2405_v15 }
 0x491   :  { %2135 = vmatmul.mubr.msk.bf16.vlgmr.msra.gmra.mxu0 %vm237_vm3, %v483_v3 }
 0x492   :  { %2146 = vmatprep.mubr.msk.bf16.mxu0 %vm2406_vm1, %v2405_v15 }
 0x4a9   :  { %v592_v4 = vpop.xlane.xlu1 %591 }
 0x4aa   :  { %2339 = vrcp.f32 %v592_v4 }
 0x4ad   :  { %v597_v6 = vpop.permute.xlu1 %596 }
 0x4ae   :  { %v602_v7 = vsel %vm255_vm4, %v597_v6, 0 }
 0x4af   :  { %2145 = vmatpush3.bf16.msra.mxu0 %v602_v7 }
 0x4b0   :  { %2158 = vmatprep.subr.bf16.mxu0 %v2405_v15 }
 0x4b7   :  { %v2340_v8 = vpop.eup %2339 }
 0x4b8   :  { %v594_v10 = vmul.f32 %v2340_v8, %v2332_v47 }
 0x4ba   :  { %v595_v11 = vpack.c.bf16 %v594_v10, %v594_v10 }
 0x4bc   :  { %2147 = vmatmul.mubr.msk.bf16.vlgmr.msra.gmra.mxu0 %vm237_vm3, %v595_v11  ;;  %v741_v11 = vrot.slane %v2643_v41, %v2584_v5 }
 0x4bd   :  { %2162 = vmatprep.mubr.msk.bf16.mxu0 %vm2406_vm1, %v2405_v15 }
 0x541   :  { %v293_v13 = vpop.f32.mrf.mxu0 }
 0x543   :  { %v2112_v14 = vpop.f32.mrf.mxu0 }
 0x545   :  { %v296_v16 = vpop.f32.mrf.mxu0 }
 0x547   :  { %v2113_v17 = vpop.f32.mrf.mxu0 }
 0x548   :  { %v747_v17 = vrot.slane %v2643_v41, %v746_v12 }
 0x549   :  { %v405_v18 = vpop.f32.mrf.mxu0 }
 0x54b   :  { %v2124_v19 = vpop.f32.mrf.mxu0 }
 0x54d   :  { %v408_v20 = vpop.f32.mrf.mxu0 }
 0x54f   :  { %v2125_v21 = vpop.f32.mrf.mxu0 }
 0x551   :  { %v526_v22 = vpop.f32.mrf.mxu0 }
 0x553   :  { %v2136_v23 = vpop.f32.mrf.mxu0 }
 0x554   :  { %v2304_v23 = vld [vmem:[%s2917_s8 + $0x10] sm:$0xff]  }
 0x555   :  { %v529_v24 = vpop.f32.mrf.mxu0 }
 0x556   :  { %v2305_v24 = vld [vmem:[%s2917_s8 + $0x8] sm:$0xff]  }
 0x557   :  { %v2137_v25 = vpop.f32.mrf.mxu0 }
 0x558   :  { %v2306_v25 = vld [vmem:[%s2917_s8] sm:$0xff]  }
 0x57c   :  { %v638_v27 = vpop.f32.mrf.mxu0 }
 0x57d   :  { %v2287_v28 = vpack.i.bf16 %v638_v27, %v405_v18 }
 0x57e   :  { %v2148_v29 = vpop.f32.mrf.mxu0 }
 0x57f   :  { %2288 = vrot.lane.b32.xlu0 %v2287_v28, %s2412_s18 }
 0x580   :  { %v641_v30 = vpop.f32.mrf.mxu0 }
 0x582   :  { %v2149_v33 = vpop.f32.mrf.mxu0 }
 0x5f1   :  { %v2289_v34 = vpop.permute.xlu0 %2288 }
 0x5f2   :  { %v2291_v35 = vunpack.i.h.bf16 %v2289_v34  ;;  %v2290_v36 = vunpack.i.l.bf16 %v2289_v34 }
 0x5f4   :  { %v648_v37 = vsel %vm184_vm2, %v526_v22, %v2291_v35  ;;  %v415_v39 = vsel %vm184_vm2, %v293_v13, %v2290_v36  ;;  %v2303_v22 = vld [vmem:[%s2917_s8 + $0x18] sm:$0xff]  }
 0x5f5   :  { %v649_v40 = vpack.c.bf16 %v648_v37, %v415_v39 }
 0x5f7   :  { %2155 = vmatmul.mubr.msk.bf16.vlgmr.msra.gmra.mxu1 %vm53_vm0, %v649_v40 }
 0x5f8   :  { %2174 = vmatprep.mubr.msk.bf16.mxu1 %vm2406_vm1, %v2405_v15  ;;  %2167 = vmatpush3.bf16.msra.mxu1 %v2303_v22 }
 0x5f9   :  { %2168 = vmatprep.subr.bf16.mxu1 %v2405_v15 }
 0x5fc   :  { %2169 = vmatpush3.bf16.msra.mxu1 %v2304_v23 }
 0x5fd   :  { %2170 = vmatprep.subr.bf16.mxu1 %v2405_v15 }
 0x600   :  { %2171 = vmatpush3.bf16.msra.mxu1 %v2305_v24 }
 0x601   :  { %2172 = vmatprep.subr.bf16.mxu1 %v2405_v15 }
 0x604   :  { %2173 = vmatpush3.bf16.msra.mxu1 %v2306_v25 }
 0x605   :  { %2192 = vmatprep.subr.bf16.mxu1 %v2405_v15 }
 0x6b7   :  { %v703_v44 = vpop.f32.mrf.mxu1 }
 0x6b8   :  { %v704_v45 = vadd.f32 %v703_v44, %v653_v43 }
 0x6b9   :  { %v2156_v46 = vpop.f32.mrf.mxu1 }
 0x6ba   :  { %v710_v47 = vadd.f32 %v704_v45, %v2519_v31 }
 0x6bb   :  { %v706_v48 = vpop.f32.mrf.mxu1 }
 0x6bc   :  { %v707_v49 = vadd.f32 %v706_v48, %v653_v43  ;;  %v712_v50 = vsel %vm53_vm0, %v710_v47, 0.0 }
 0x6bd   :  { %713 = vadd.xlane.f32.xlu1 %v712_v50  ;;  %v2157_v51 = vpop.f32.mrf.mxu1 }
 0x6be   :  { %v711_v52 = vadd.f32 %v707_v49, %v2521_v32  ;;  %v2301_v32 = vld [vmem:[%s2915_s6 + $0x8] sm:$0xff]  }
 0x6bf   :  { %2159 = vmatpush3.bf16.msra.mxu0 %v2301_v32 }
 0x6c0   :  { %v715_v53 = vsel %vm53_vm0, %v711_v52, 0.0  ;;  %2160 = vmatprep.subr.bf16.mxu0 %v2405_v15 }
 0x6c1   :  { %716 = vadd.xlane.f32.xlu0 %v715_v53 }
 0x6c3   :  { %2161 = vmatpush3.bf16.msra.mxu0 %v2302_v0 }
 0x6c4   :  { %2178 = vmatprep.subr.bf16.mxu0 %v2405_v15 }
 0x746   :  { %v714_v38 = vpop.xlane.xlu1 %713 }
 0x747   :  { %v718_v56 = vmul.f32 0.03125, %v714_v38 }
 0x749   :  { %v720_v58 = vsub.f32 %v710_v47, %v718_v56 }
 0x74a   :  { %v717_v59 = vpop.xlane.xlu0 %716 }
 0x74b   :  { %v719_v60 = vmul.f32 0.03125, %v717_v59  ;;  %v722_v42 = vmul.f32 %v720_v58, %v720_v58  ;;  %v834_v59 = vsub.s32 3, %v2569_v54 }
 0x74d   :  { %v721_v61 = vsub.f32 %v711_v52, %v719_v60  ;;  %v724_v31 = vsel %vm53_vm0, %v722_v42, 0.0  ;;  %v835_v60 = vrot.slane %v2643_v41, %v834_v59 }
 0x74e   :  { %725 = vadd.xlane.f32.xlu0 %v724_v31 }
 0x74f   :  { %v723_v62 = vmul.f32 %v721_v61, %v721_v61 }
 0x751   :  { %v727_v63 = vsel %vm53_vm0, %v723_v62, 0.0 }
 0x752   :  { %728 = vadd.xlane.f32.xlu0 %v727_v63 }
 0x7d7   :  { %v726_v1 = vpop.xlane.xlu0 %725 }
 0x7d8   :  { %v730_v2 = vmul.f32 0.03125, %v726_v1 }
 0x7da   :  { %v732_v3 = vadd.f32 1e-12, %v730_v2 }
 0x7db   :  { %v729_v4 = vpop.xlane.xlu0 %728 }
 0x7dc   :  { %2341 = vrsqrt.f32 %v732_v3  ;;  %v731_v6 = vmul.f32 0.03125, %v729_v4 }
 0x7de   :  { %v733_v7 = vadd.f32 1e-12, %v731_v6 }
 0x7e0   :  { %2343 = vrsqrt.f32 %v733_v7 }
 0x7e9   :  { %v2342_v8 = vpop.eup %2341 }
 0x7ea   :  { %v736_v10 = vmul.f32 %v2342_v8, %v720_v58 }
 0x7ec   :  { %v742_v16 = vmul.f32 %v741_v11, %v736_v10 }
 0x7ed   :  { %v2344_v13 = vpop.eup %2343 }
 0x7ee   :  { %v737_v14 = vmul.f32 %v2344_v13, %v721_v61  ;;  %v748_v19 = vadd.f32 %v747_v17, %v742_v16 }
 0x7f0   :  { %v743_v18 = vmul.f32 %v741_v11, %v737_v14 }
 0x7f2   :  { %v749_v20 = vadd.f32 %v747_v17, %v743_v18  ;;  %v2307_v18 = vld [vmem:[%s2912_s3 + $0x18] sm:$0xff]  }
 0x7f4   :  { %v750_v21 = vpack.c.bf16 %v749_v20, %v748_v19 }
 0x7f6   :  { %2163 = vmatmul.mubr.msk.bf16.vlgmr.msra.gmra.mxu0 %vm53_vm0, %v750_v21 }
 0x7f7   :  { %2182 = vmatprep.mubr.msk.bf16.mxu0 %vm2406_vm1, %v2405_v15  ;;  %2179 = vmatpush3.bf16.msra.mxu0 %v2307_v18 }
 0x7f8   :  { %2180 = vmatprep.subr.bf16.mxu0 %v2405_v15 }
 0x8b6   :  { %v806_v27 = vpop.f32.mrf.mxu0 }
 0x8b7   :  { %v807_v28 = vadd.f32 %v1964_v26, %v806_v27 }
 0x8b8   :  { %v2164_v29 = vpop.f32.mrf.mxu0 }
 0x8b9   :  { %v813_v30 = vmul.f32 %v807_v28, %v807_v28 }
 0x8ba   :  { %v809_v33 = vpop.f32.mrf.mxu0 }
 0x8bb   :  { %v815_v34 = vmul.f32 %v813_v30, %v807_v28  ;;  %v810_v35 = vadd.f32 %v1964_v26, %v809_v33  ;;  %v935_v26 = vsub.s32 4, %v2569_v54  ;;  %v941_v30 = vsub.s32 5, %v2569_v54  ;;  %v2320_v54 = vld [vmem:[%s2921_s12] sm:$0xff]  }
 0x8bc   :  { %v2165_v36 = vpop.f32.mrf.mxu0 }
 0x8bd   :  { %v817_v37 = vmul.f32 0.044715, %v815_v34  ;;  %v814_v39 = vmul.f32 %v810_v35, %v810_v35  ;;  %v936_v29 = vrot.slane %v2643_v41, %v935_v26  ;;  %v942_v36 = vrot.slane %v2643_v41, %v941_v30 }
 0x8bf   :  { %v819_v40 = vadd.f32 %v817_v37, %v807_v28  ;;  %v816_v43 = vmul.f32 %v814_v39, %v810_v35 }
 0x8c1   :  { %v821_v44 = vmul.f32 0.7978846, %v819_v40  ;;  %v818_v45 = vmul.f32 0.044715, %v816_v43 }
 0x8c3   :  { %2345 = vtanh.f32 %v821_v44  ;;  %v820_v46 = vadd.f32 %v818_v45, %v810_v35  ;;  %v1996_v44 = vld [vmem:[%s2913_s4 + $0x1] ss:$0 sm:$0xff] }
 0x8c5   :  { %v822_v47 = vmul.f32 0.7978846, %v820_v46 }
 0x8c7   :  { %2347 = vtanh.f32 %v822_v47 }
 0x8d0   :  { %v2346_v48 = vpop.eup %2345 }
 0x8d1   :  { %v825_v49 = vadd.f32 1.0, %v2346_v48 }
 0x8d3   :  { %v827_v51 = vmul.f32 0.5, %v825_v49 }
 0x8d4   :  { %v2348_v50 = vpop.eup %2347 }
 0x8d5   :  { %v826_v52 = vadd.f32 1.0, %v2348_v50  ;;  %v829_v38 = vmul.f32 %v827_v51, %v807_v28 }
 0x8d7   :  { %v828_v53 = vmul.f32 0.5, %v826_v52 }
 0x8d9   :  { %v830_v56 = vmul.f32 %v828_v53, %v810_v35 }
 0x8db   :  { %v831_v58 = vpack.c.bf16 %v830_v56, %v829_v38 }
 0x8dd   :  { %2175 = vmatmul.mubr.msk.bf16.vlgmr.msra.gmra.mxu1 %vm860_vm5, %v831_v58 }
 0x8de   :  { %2194 = vmatprep.mubr.msk.bf16.mxu1 %vm2406_vm1, %v2405_v15 }
 0x99d   :  { %v898_v42 = vpop.f32.mrf.mxu1 }
 0x99e   :  { %v899_v61 = vadd.f32 %v898_v42, %v835_v60 }
 0x99f   :  { %v2176_v31 = vpop.f32.mrf.mxu1 }
 0x9a0   :  { %v905_v62 = vadd.f32 %v899_v61, %v748_v19  ;;  %v2308_v19 = vld [vmem:[%s2912_s3 + $0x10] sm:$0xff]  }
 0x9a1   :  { %v901_v63 = vpop.f32.mrf.mxu1  ;;  %2181 = vmatpush3.bf16.msra.mxu0 %v2308_v19 }
 0x9a2   :  { %v902_v32 = vadd.f32 %v901_v63, %v835_v60  ;;  %v907_v0 = vsel %vm53_vm0, %v905_v62, 0.0  ;;  %2186 = vmatprep.subr.bf16.mxu0 %v2405_v15 }
 0x9a3   :  { %908 = vadd.xlane.f32.xlu1 %v907_v0  ;;  %v2177_v1 = vpop.f32.mrf.mxu1 }
 0x9a4   :  { %v906_v2 = vadd.f32 %v902_v32, %v749_v20 }
 0x9a6   :  { %v910_v3 = vsel %vm53_vm0, %v906_v2, 0.0 }
 0x9a7   :  { %911 = vadd.xlane.f32.xlu0 %v910_v3 }
 0xa2c   :  { %v909_v4 = vpop.xlane.xlu1 %908 }
 0xa2d   :  { %v913_v6 = vmul.f32 0.03125, %v909_v4 }
 0xa2f   :  { %v915_v7 = vsub.f32 %v905_v62, %v913_v6 }
 0xa30   :  { %v912_v8 = vpop.xlane.xlu0 %911 }
 0xa31   :  { %v914_v10 = vmul.f32 0.03125, %v912_v8  ;;  %v917_v11 = vmul.f32 %v915_v7, %v915_v7 }
 0xa33   :  { %v916_v13 = vsub.f32 %v906_v2, %v914_v10  ;;  %v919_v14 = vsel %vm53_vm0, %v917_v11, 0.0 }
 0xa34   :  { %920 = vadd.xlane.f32.xlu1 %v919_v14 }
 0xa35   :  { %v918_v16 = vmul.f32 %v916_v13, %v916_v13 }
 0xa37   :  { %v922_v17 = vsel %vm53_vm0, %v918_v16, 0.0 }
 0xa38   :  { %923 = vadd.xlane.f32.xlu0 %v922_v17 }
 0xabd   :  { %v921_v20 = vpop.xlane.xlu1 %920 }
 0xabe   :  { %v925_v21 = vmul.f32 0.03125, %v921_v20 }
 0xac0   :  { %v927_v22 = vadd.f32 1e-12, %v925_v21 }
 0xac1   :  { %v924_v23 = vpop.xlane.xlu0 %923 }
 0xac2   :  { %2349 = vrsqrt.f32 %v927_v22  ;;  %v926_v24 = vmul.f32 0.03125, %v924_v23 }
 0xac4   :  { %v928_v25 = vadd.f32 1e-12, %v926_v24 }
 0xac6   :  { %2351 = vrsqrt.f32 %v928_v25 }
 0xacf   :  { %v2350_v27 = vpop.eup %2349 }
 0xad0   :  { %v931_v28 = vmul.f32 %v2350_v27, %v915_v7 }
 0xad2   :  { %v937_v35 = vmul.f32 %v936_v29, %v931_v28 }
 0xad3   :  { %v2352_v33 = vpop.eup %2351 }
 0xad4   :  { %v932_v34 = vmul.f32 %v2352_v33, %v916_v13  ;;  %v2716_v39 = vadd.f32 %v942_v36, %v937_v35 }
 0xad6   :  { %v938_v37 = vmul.f32 %v936_v29, %v932_v34 }
 0xad8   :  { %v2718_v40 = vadd.f32 %v942_v36, %v938_v37 }
 0xada   :  { %v975_v43 = vpack.c.bf16 %v2718_v40, %v2716_v39 }
 0xadc   :  { %2183 = vmatmul.mubr.msk.bf16.vlgmr.msra.gmra.mxu0 %vm53_vm0, %v975_v43 }
 0xadd   :  { %2188 = vmatprep.mubr.msk.bf16.mxu0 %vm2406_vm1, %v2405_v15 }
 0xb9c   :  { %v1031_v45 = vpop.f32.mrf.mxu0 }
 0xb9d   :  { %v1032_v46 = vadd.f32 %v1996_v44, %v1031_v45 }
 0xb9e   :  { %v2184_v41 = vpop.f32.mrf.mxu0 }
 0xb9f   :  { %v2728_v47 = vpack.c.bf16 %v1032_v46, %v1032_v46 }
 0xba0   :  { %v1034_v48 = vpop.f32.mrf.mxu0 }
 0xba1   :  { %v1035_v49 = vadd.f32 %v1996_v44, %v1034_v48  ;;  %1152 = vrot.lane.b32.xlu0 %v2728_v47, %s2407_s2  ;;  %1040 = vrot.lane.b32.xlu1 %v2728_v47, %s2408_s26 }
 0xba2   :  { %v2185_v50 = vpop.f32.mrf.mxu0 }
 0xba3   :  { %v2734_v51 = vpack.c.bf16 %v1035_v49, %v1035_v49 }
 0xba5   :  { %1150 = vrot.lane.b32.xlu1 %v2728_v47, %s2409_s27  ;;  %1379 = vrot.lane.b32.xlu0 %v2734_v51, %s2409_s27 }
 0xba9   :  { %1269 = vrot.lane.b32.xlu1 %v2734_v51, %s2408_s26 }
 0xbad   :  { %1381 = vrot.lane.b32.xlu1 %v2734_v51, %s2407_s2 }
 0xc13   :  { %v1041_v52 = vpop.permute.xlu1 %1040  ;;  %v1153_v38 = vpop.permute.xlu0 %1152 }
 0xc14   :  { %v1046_v53 = vsel %vm184_vm2, %v1041_v52, 0  ;;  %v1158_v58 = vsel %vm184_vm2, %v1153_v38, 0 }
 0xc15   :  { %2187 = vmatpush3.bf16.xpose.msra.mxu0 %v1046_v53 }
 0xc16   :  { %2198 = vmatprep.subr.bf16.mxu0 %v2405_v15 }
 0xc17   :  { %v1151_v56 = vpop.permute.xlu1 %1150  ;;  %v1380_v62 = vpop.permute.xlu0 %1379 }
 0xc1b   :  { %v1270_v60 = vpop.permute.xlu1 %1269 }
 0xc1c   :  { %2189 = vmatmul.mubr.msk.bf16.vlgmr.msra.gmra.mxu0 %vm184_vm2, %v2728_v47  ;;  %v1275_v42 = vsel %vm184_vm2, %v1270_v60, 0 }
 0xc1d   :  { %2199 = vmatpush3.bf16.xpose.msra.mxu0 %v1158_v58  ;;  %2200 = vmatprep.mubr.msk.bf16.mxu0 %vm2406_vm1, %v2405_v15 }
 0xc1e   :  { %2210 = vmatprep.subr.bf16.mxu0 %v2405_v15 }
 0xc1f   :  { %v1382_v61 = vpop.permute.xlu1 %1381 }
 0xc20   :  { %v1387_v31 = vsel %vm184_vm2, %v1382_v61, 0 }
 0xc24   :  { %2201 = vmatmul.mubr.msk.bf16.vlgmr.msra.gmra.mxu0 %vm184_vm2, %v1151_v56 }
 0xc25   :  { %2211 = vmatpush3.bf16.xpose.msra.mxu0 %v1275_v42  ;;  %2212 = vmatprep.mubr.msk.bf16.mxu0 %vm2406_vm1, %v2405_v15 }
 0xc26   :  { %2222 = vmatprep.subr.bf16.mxu0 %v2405_v15 }
 0xc2c   :  { %2213 = vmatmul.mubr.msk.bf16.vlgmr.msra.gmra.mxu0 %vm184_vm2, %v2734_v51 }
 0xc2d   :  { %2223 = vmatpush3.bf16.xpose.msra.mxu0 %v1387_v31  ;;  %2224 = vmatprep.mubr.msk.bf16.mxu0 %vm2406_vm1, %v2405_v15 }
 0xc2e   :  { %2234 = vmatprep.subr.bf16.mxu0 %v2405_v15 }
 0xc34   :  { %2225 = vmatmul.mubr.msk.bf16.vlgmr.msra.gmra.mxu0 %vm184_vm2, %v1380_v62 }
 0xc35   :  { %2238 = vmatprep.mubr.msk.bf16.mxu0 %vm2406_vm1, %v2405_v15 }
 0xcdc   :  { %v1082_v63 = vpop.f32.mrf.mxu0 }
 0xcdd   :  { %v1088_v32 = vmul.f32 0.25, %v1082_v63 }
 0xcde   :  { %v2190_v0 = vpop.f32.mrf.mxu0 }
 0xcdf   :  { %v1089_v1 = vadd.f32 %v1088_v32, %v2578_v57 }
 0xce0   :  { %v1085_v2 = vpop.f32.mrf.mxu0 }
 0xce1   :  { %v1090_v3 = vsel %vm237_vm3, %v1089_v1, -inf }
 0xce2   :  { %1091 = vmax.xlane.f32.xlu1 %v1090_v3  ;;  %v2191_v4 = vpop.f32.mrf.mxu0 }
 0xce4   :  { %v1194_v6 = vpop.f32.mrf.mxu0 }
 0xce5   :  { %v1200_v7 = vmul.f32 0.25, %v1194_v6 }
 0xce6   :  { %v2202_v8 = vpop.f32.mrf.mxu0 }
 0xce7   :  { %v1201_v10 = vadd.f32 %v1200_v7, %v2578_v57 }
 0xce8   :  { %v1197_v11 = vpop.f32.mrf.mxu0 }
 0xce9   :  { %v1202_v13 = vsel %vm237_vm3, %v1201_v10, -inf }
 0xcea   :  { %1203 = vmax.xlane.f32.xlu0 %v1202_v13  ;;  %v2203_v14 = vpop.f32.mrf.mxu0 }
 0xcec   :  { %v1311_v16 = vpop.f32.mrf.mxu0 }
 0xced   :  { %v1317_v17 = vmul.f32 0.25, %v1311_v16 }
 0xcee   :  { %v2214_v18 = vpop.f32.mrf.mxu0 }
 0xcef   :  { %v1318_v19 = vadd.f32 %v1317_v17, %v2588_v9 }
 0xcf0   :  { %v1314_v20 = vpop.f32.mrf.mxu0 }
 0xcf1   :  { %v1319_v21 = vsel %vm237_vm3, %v1318_v19, -inf  ;;  %v2309_v20 = vld [vmem:[%s2914_s5 + $0x18] sm:$0xff]  }
 0xcf2   :  { %1320 = vmax.xlane.f32.xlu0 %v1319_v21  ;;  %v2215_v22 = vpop.f32.mrf.mxu0  ;;  %2235 = vmatpush3.bf16.msra.mxu0 %v2309_v20 }
 0xcf3   :  { %2236 = vmatprep.subr.bf16.mxu0 %v2405_v15 }
 0xcf4   :  { %v1423_v23 = vpop.f32.mrf.mxu0 }
 0xcf5   :  { %v1429_v24 = vmul.f32 0.25, %v1423_v23 }
 0xcf6   :  { %v2226_v25 = vpop.f32.mrf.mxu0 }
 0xcf7   :  { %v1430_v57 = vadd.f32 %v1429_v24, %v2588_v9 }
 0xcf8   :  { %v1426_v27 = vpop.f32.mrf.mxu0 }
 0xcf9   :  { %v1431_v28 = vsel %vm237_vm3, %v1430_v57, -inf }
 0xcfa   :  { %1432 = vmax.xlane.f32.xlu0 %v1431_v28  ;;  %v2227_v29 = vpop.f32.mrf.mxu0 }
 0xcfb   :  { %v2310_v29 = vld [vmem:[%s2914_s5 + $0x10] sm:$0xff]  }
 0xcfc   :  { %2237 = vmatpush3.bf16.msra.mxu0 %v2310_v29  ;;  %v2315_v29 = vld [vmem:[%s2917_s8 + $0x28] sm:$0xff]  }
 0xcfd   :  { %2250 = vmatprep.subr.bf16.mxu0 %v2405_v15 }
 0xd6b   :  { %v1092_v33 = vpop.xlane.xlu1 %1091 }
 0xd6c   :  { %v1093_v34 = vsub.f32 %v1089_v1, %v1092_v33 }
 0xd6e   :  { %v1094_v35 = vmul.f32 1.442695, %v1093_v34 }
 0xd70   :  { %2353 = vpow2.f32 %v1094_v35 }
 0xd73   :  { %v1204_v36 = vpop.xlane.xlu0 %1203 }
 0xd74   :  { %v1205_v37 = vsub.f32 %v1201_v10, %v1204_v36 }
 0xd76   :  { %v1206_v43 = vmul.f32 1.442695, %v1205_v37 }
 0xd78   :  { %2355 = vpow2.f32 %v1206_v43 }
 0xd7b   :  { %v1321_v46 = vpop.xlane.xlu0 %1320 }
 0xd7c   :  { %v1322_v38 = vsub.f32 %v1318_v19, %v1321_v46 }
 0xd7d   :  { %v2354_v44 = vpop.eup %2353 }
 0xd7e   :  { %v1096_v45 = vsel %vm237_vm3, %v2354_v44, 0.0  ;;  %v1323_v56 = vmul.f32 1.442695, %v1322_v38 }
 0xd7f   :  { %1097 = vadd.xlane.f32.xlu1 %v1096_v45 }
 0xd83   :  { %v1433_v41 = vpop.xlane.xlu0 %1432 }
 0xd84   :  { %v1434_v9 = vsub.f32 %v1430_v57, %v1433_v41 }
 0xd85   :  { %v2356_v48 = vpop.eup %2355 }
 0xd86   :  { %v1435_v49 = vmul.f32 1.442695, %v1434_v9  ;;  %v1208_v50 = vsel %vm237_vm3, %v2356_v48, 0.0 }
 0xd87   :  { %1209 = vadd.xlane.f32.xlu0 %v1208_v50 }
 0xd88   :  { %2357 = vpow2.f32 %v1435_v49 }
 0xd89   :  { %2359 = vpow2.f32 %v1323_v56 }
 0xd90   :  { %1102 = vrot.lane.b32.xlu1 %v2728_v47, %s2411_s30 }
 0xd95   :  { %v2358_v52 = vpop.eup %2357 }
 0xd96   :  { %v1437_v53 = vsel %vm237_vm3, %v2358_v52, 0.0  ;;  %v2360_v58 = vpop.eup %2359 }
 0xd97   :  { %1438 = vadd.xlane.f32.xlu0 %v1437_v53  ;;  %v1325_v60 = vsel %vm237_vm3, %v2360_v58, 0.0  ;;  %v2823_v53 = vld [vmem:[%s2918_s9 + $0x8] sm:$0x3f] }
 0xd98   :  { %v1500_v38 = vrot.slane %v2823_v53, %v2572_v55  ;;  %v1588_v20 = vrot.slane %v2823_v53, %v2584_v5  ;;  %v2313_v5 = vld [vmem:[%s2917_s8 + $0x38] sm:$0xff]  }
 0xdad   :  { %1214 = vrot.lane.b32.xlu0 %v2728_v47, %s2410_s1 }
 0xdb4   :  { %1326 = vadd.xlane.f32.xlu1 %v1325_v60 }
 0xdc5   :  { %1331 = vrot.lane.b32.xlu1 %v2734_v51, %s2411_s30 }
 0xdc9   :  { %1443 = vrot.lane.b32.xlu1 %v2734_v51, %s2410_s1 }
 0xe08   :  { %v1098_v42 = vpop.xlane.xlu1 %1097 }
 0xe09   :  { %2361 = vrcp.f32 %v1098_v42 }
 0xe0c   :  { %v1103_v61 = vpop.permute.xlu1 %1102 }
 0xe0d   :  { %v1108_v31 = vsel %vm255_vm4, %v1103_v61, 0 }
 0xe0e   :  { %2193 = vmatpush3.bf16.msra.mxu1 %v1108_v31 }
 0xe0f   :  { %2204 = vmatprep.subr.bf16.mxu1 %v2405_v15 }
 0xe10   :  { %v1210_v62 = vpop.xlane.xlu0 %1209 }
 0xe11   :  { %2363 = vrcp.f32 %v1210_v62 }
 0xe16   :  { %v2362_v47 = vpop.eup %2361 }
 0xe17   :  { %v1100_v63 = vmul.f32 %v2362_v47, %v2354_v44 }
 0xe19   :  { %v1101_v32 = vpack.c.bf16 %v1100_v63, %v1100_v63 }
 0xe1b   :  { %2195 = vmatmul.mubr.msk.bf16.vlgmr.msra.gmra.mxu1 %vm237_vm3, %v1101_v32 }
 0xe1c   :  { %2206 = vmatprep.mubr.msk.bf16.mxu1 %vm2406_vm1, %v2405_v15 }
 0xe1e   :  { %v2364_v0 = vpop.eup %2363 }
 0xe1f   :  { %v1212_v1 = vmul.f32 %v2364_v0, %v2356_v48 }
 0xe20   :  { %v1439_v51 = vpop.xlane.xlu0 %1438 }
 0xe21   :  { %v1213_v4 = vpack.c.bf16 %v1212_v1, %v1212_v1 }
 0xe24   :  { %v1215_v2 = vpop.permute.xlu0 %1214 }
 0xe25   :  { %v1220_v3 = vsel %vm255_vm4, %v1215_v2, 0 }
 0xe26   :  { %2205 = vmatpush3.bf16.msra.mxu1 %v1220_v3 }
 0xe27   :  { %2216 = vmatprep.subr.bf16.mxu1 %v2405_v15 }
 0xe29   :  { %2207 = vmatmul.mubr.msk.bf16.vlgmr.msra.gmra.mxu1 %vm237_vm3, %v1213_v4 }
 0xe2a   :  { %2218 = vmatprep.mubr.msk.bf16.mxu1 %vm2406_vm1, %v2405_v15 }
 0xe3d   :  { %v1327_v6 = vpop.xlane.xlu1 %1326 }
 0xe3e   :  { %2365 = vrcp.f32 %v1327_v6 }
 0xe3f   :  { %2367 = vrcp.f32 %v1439_v51 }
 0xe41   :  { %v1332_v7 = vpop.permute.xlu1 %1331 }
 0xe42   :  { %v1337_v8 = vsel %vm255_vm4, %v1332_v7, 0 }
 0xe43   :  { %2217 = vmatpush3.bf16.msra.mxu1 %v1337_v8  ;;  %v2312_v8 = vld [vmem:[%s2915_s6 + $0x10] sm:$0xff]  }
 0xe44   :  { %2228 = vmatprep.subr.bf16.mxu1 %v2405_v15 }
 0xe45   :  { %v1444_v13 = vpop.permute.xlu1 %1443 }
 0xe46   :  { %v1449_v17 = vsel %vm255_vm4, %v1444_v13, 0 }
 0xe4b   :  { %v2366_v10 = vpop.eup %2365 }
 0xe4c   :  { %v1329_v11 = vmul.f32 %v2366_v10, %v2360_v58  ;;  %v2368_v16 = vpop.eup %2367 }
 0xe4d   :  { %v1441_v18 = vmul.f32 %v2368_v16, %v2358_v52 }
 0xe4e   :  { %v1330_v14 = vpack.c.bf16 %v1329_v11, %v1329_v11 }
 0xe4f   :  { %v1442_v19 = vpack.c.bf16 %v1441_v18, %v1441_v18 }
 0xe50   :  { %2219 = vmatmul.mubr.msk.bf16.vlgmr.msra.gmra.mxu1 %vm237_vm3, %v1330_v14 }
 0xe51   :  { %2229 = vmatpush3.bf16.msra.mxu1 %v1449_v17  ;;  %2230 = vmatprep.mubr.msk.bf16.mxu1 %vm2406_vm1, %v2405_v15 }
 0xe52   :  { %2242 = vmatprep.subr.bf16.mxu1 %v2405_v15 }
 0xe58   :  { %2231 = vmatmul.mubr.msk.bf16.vlgmr.msra.gmra.mxu1 %vm237_vm3, %v1442_v19 }
 0xe59   :  { %2246 = vmatprep.mubr.msk.bf16.mxu1 %vm2406_vm1, %v2405_v15 }
 0xedb   :  { %v1144_v21 = vpop.f32.mrf.mxu1 }
 0xedd   :  { %v2196_v22 = vpop.f32.mrf.mxu1 }
 0xedf   :  { %v1147_v23 = vpop.f32.mrf.mxu1 }
 0xee1   :  { %v2197_v24 = vpop.f32.mrf.mxu1 }
 0xee2   :  { %v1594_v24 = vrot.slane %v2823_v53, %v746_v12  ;;  %v2314_v12 = vld [vmem:[%s2917_s8 + $0x30] sm:$0xff]  }
 0xee9   :  { %v1256_v25 = vpop.f32.mrf.mxu1 }
 0xeeb   :  { %v2208_v57 = vpop.f32.mrf.mxu1 }
 0xeed   :  { %v1259_v27 = vpop.f32.mrf.mxu1 }
 0xeef   :  { %v2209_v28 = vpop.f32.mrf.mxu1 }
 0xf10   :  { %v1373_v33 = vpop.f32.mrf.mxu1 }
 0xf12   :  { %v2220_v34 = vpop.f32.mrf.mxu1 }
 0xf13   :  { %v2011_v34 = vld [vmem:[%s2916_s7 + $0x1] ss:$0 sm:$0xff] }
 0xf14   :  { %v1376_v35 = vpop.f32.mrf.mxu1 }
 0xf16   :  { %v2221_v36 = vpop.f32.mrf.mxu1 }
 0xf18   :  { %v1485_v37 = vpop.f32.mrf.mxu1 }
 0xf19   :  { %v2292_v43 = vpack.i.bf16 %v1485_v37, %v1256_v25 }
 0xf1a   :  { %v2232_v44 = vpop.f32.mrf.mxu1 }
 0xf1b   :  { %2293 = vrot.lane.b32.xlu1 %v2292_v43, %s2412_s18 }
 0xf1c   :  { %v1488_v45 = vpop.f32.mrf.mxu1 }
 0xf1e   :  { %v2233_v46 = vpop.f32.mrf.mxu1 }
 0xf8d   :  { %v2294_v41 = vpop.permute.xlu1 %2293 }
 0xf8e   :  { %v2296_v9 = vunpack.i.h.bf16 %v2294_v41  ;;  %v2295_v48 = vunpack.i.l.bf16 %v2294_v41 }
 0xf90   :  { %v1495_v49 = vsel %vm184_vm2, %v1373_v33, %v2296_v9  ;;  %v1266_v50 = vsel %vm184_vm2, %v1144_v21, %v2295_v48  ;;  %v2316_v33 = vld [vmem:[%s2917_s8 + $0x20] sm:$0xff]  }
 0xf91   :  { %v1496_v52 = vpack.c.bf16 %v1495_v49, %v1266_v50 }
 0xf93   :  { %2239 = vmatmul.mubr.msk.bf16.vlgmr.msra.gmra.mxu0 %vm53_vm0, %v1496_v52 }
 0xf94   :  { %2258 = vmatprep.mubr.msk.bf16.mxu0 %vm2406_vm1, %v2405_v15  ;;  %2251 = vmatpush3.bf16.msra.mxu0 %v2313_v5 }
 0xf95   :  { %2252 = vmatprep.subr.bf16.mxu0 %v2405_v15 }
 0xf98   :  { %2253 = vmatpush3.bf16.msra.mxu0 %v2314_v12  ;;  %v1782_v12 = vrot.slane %v2823_v53, %v935_v26  ;;  %v2319_v26 = vld [vmem:[%s2921_s12 + $0x8] sm:$0xff]   ;;  %s2413_s12 = smov [#allocation2]  }
 0xf99   :  { %2254 = vmatprep.subr.bf16.mxu0 %v2405_v15  ;;  %s1939_s1 = sshll.u32 %s2413_s12, 4  ;;  %s1940_s1 = int_to_ptr.vmem [resolvable:$true] %s1939_s1 }
 0xf9a   :  { %p2388_p1 = scmp.lt.s32.totalorder %s1940_s1, %s1940_s1 }
 0xf9c   :  { %2255 = vmatpush3.bf16.msra.mxu0 %v2315_v29 }
 0xf9d   :  { %2256 = vmatprep.subr.bf16.mxu0 %v2405_v15 }
 0xfa0   :  { %2257 = vmatpush3.bf16.msra.mxu0 %v2316_v33 }
0x1053   :  { %v1550_v56 = vpop.f32.mrf.mxu0 }
0x1054   :  { %v1551_v58 = vadd.f32 %v1550_v56, %v1500_v38 }
0x1055   :  { %v2240_v60 = vpop.f32.mrf.mxu0 }
0x1056   :  { %v1557_v42 = vadd.f32 %v1551_v58, %v2716_v39 }
0x1057   :  { %v1553_v61 = vpop.f32.mrf.mxu0 }
0x1058   :  { %v1554_v31 = vadd.f32 %v1553_v61, %v1500_v38  ;;  %v1559_v62 = vsel %vm53_vm0, %v1557_v42, 0.0 }
0x1059   :  { %1560 = vadd.xlane.f32.xlu0 %v1559_v62  ;;  %v2241_v47 = vpop.f32.mrf.mxu0 }
0x105a   :  { %v1558_v63 = vadd.f32 %v1554_v31, %v2718_v40  ;;  %v2311_v40 = vld [vmem:[%s2915_s6 + $0x18] sm:$0xff]  }
0x105b   :  { %2243 = vmatpush3.bf16.msra.mxu1 %v2311_v40 }
0x105c   :  { %v1562_v32 = vsel %vm53_vm0, %v1558_v63, 0.0  ;;  %2244 = vmatprep.subr.bf16.mxu1 %v2405_v15 }
0x105d   :  { %1563 = vadd.xlane.f32.xlu1 %v1562_v32 }
0x105f   :  { %2245 = vmatpush3.bf16.msra.mxu1 %v2312_v8 }
0x1060   :  { %2262 = vmatprep.subr.bf16.mxu1 %v2405_v15 }
0x10e2   :  { %v1561_v0 = vpop.xlane.xlu0 %1560 }
0x10e3   :  { %v1565_v51 = vmul.f32 0.03125, %v1561_v0 }
0x10e5   :  { %v1567_v1 = vsub.f32 %v1557_v42, %v1565_v51  ;;  %v1682_v51 = vrot.slane %v2823_v53, %v834_v59 }
0x10e6   :  { %v1564_v55 = vpop.xlane.xlu1 %1563 }
0x10e7   :  { %v1566_v2 = vmul.f32 0.03125, %v1564_v55  ;;  %v1569_v3 = vmul.f32 %v1567_v1, %v1567_v1 }
0x10e9   :  { %v1568_v4 = vsub.f32 %v1558_v63, %v1566_v2  ;;  %v1571_v39 = vsel %vm53_vm0, %v1569_v3, 0.0 }
0x10ea   :  { %1572 = vadd.xlane.f32.xlu0 %v1571_v39 }
0x10eb   :  { %v1570_v6 = vmul.f32 %v1568_v4, %v1568_v4 }
0x10ed   :  { %v1574_v7 = vsel %vm53_vm0, %v1570_v6, 0.0 }
0x10ee   :  { %1575 = vadd.xlane.f32.xlu0 %v1574_v7 }
0x1173   :  { %v1573_v10 = vpop.xlane.xlu0 %1572 }
0x1174   :  { %v1577_v11 = vmul.f32 0.03125, %v1573_v10 }
0x1176   :  { %v1579_v13 = vadd.f32 1e-12, %v1577_v11 }
0x1177   :  { %v1576_v14 = vpop.xlane.xlu0 %1575 }
0x1178   :  { %2369 = vrsqrt.f32 %v1579_v13  ;;  %v1578_v16 = vmul.f32 0.03125, %v1576_v14 }
0x117a   :  { %v1580_v17 = vadd.f32 1e-12, %v1578_v16 }
0x117c   :  { %2371 = vrsqrt.f32 %v1580_v17 }
0x1185   :  { %v2370_v18 = vpop.eup %2369 }
0x1186   :  { %v1583_v19 = vmul.f32 %v2370_v18, %v1567_v1 }
0x1188   :  { %v1589_v23 = vmul.f32 %v1588_v20, %v1583_v19 }
0x1189   :  { %v2372_v21 = vpop.eup %2371 }
0x118a   :  { %v1584_v22 = vmul.f32 %v2372_v21, %v1568_v4  ;;  %v1595_v57 = vadd.f32 %v1594_v24, %v1589_v23  ;;  %v2317_v21 = vld [vmem:[%s2919_s10 + $0x8] sm:$0xff]  }
0x118c   :  { %v1590_v25 = vmul.f32 %v1588_v20, %v1584_v22  ;;  %v2318_v22 = vld [vmem:[%s2919_s10] sm:$0xff]  }
0x118e   :  { %v1596_v27 = vadd.f32 %v1594_v24, %v1590_v25 }
0x1190   :  { %v1597_v28 = vpack.c.bf16 %v1596_v27, %v1595_v57 }
0x1192   :  { %2247 = vmatmul.mubr.msk.bf16.vlgmr.msra.gmra.mxu1 %vm53_vm0, %v1597_v28 }
0x1193   :  { %2266 = vmatprep.mubr.msk.bf16.mxu1 %vm2406_vm1, %v2405_v15  ;;  %2263 = vmatpush3.bf16.msra.mxu1 %v2317_v21 }
0x1194   :  { %2264 = vmatprep.subr.bf16.mxu1 %v2405_v15 }
0x1197   :  { %2265 = vmatpush3.bf16.msra.mxu1 %v2318_v22 }
0x1198   :  { %2270 = vmatprep.subr.bf16.mxu1 %v2405_v15 }
0x1252   :  { %v1653_v35 = vpop.f32.mrf.mxu1 }
0x1253   :  { %v1654_v36 = vadd.f32 %v2011_v34, %v1653_v35 }
0x1254   :  { %v2248_v37 = vpop.f32.mrf.mxu1 }
0x1255   :  { %v1660_v43 = vmul.f32 %v1654_v36, %v1654_v36  ;;  %v1788_v37 = vrot.slane %v2823_v53, %v941_v30  ;;  %v2020_v30 = vld [vmem:[%s2920_s11] ss:$0 sm:$0xff]  ;;  %s2383_s11 = scalar_lea.vmem %s1940_s1, 32 }
0x1256   :  { %v1656_v44 = vpop.f32.mrf.mxu1  ;;  %p2384_p0 = scmp.ne.s32.totalorder %s1940_s1, %s2383_s11  ;;  %p2389_p2 = scmp.lt.s32.totalorder %s2383_s11, %s2383_s11 }
0x1257   :  { %v1662_v45 = vmul.f32 %v1660_v43, %v1654_v36  ;;  %v1657_v46 = vadd.f32 %v2011_v34, %v1656_v44 }
0x1258   :  { %v2249_v41 = vpop.f32.mrf.mxu1  ;;  %p2390_p3 = por %p2389_p2, %p2388_p1 }
0x1259   :  { %v1664_v9 = vmul.f32 0.044715, %v1662_v45  ;;  %v1661_v48 = vmul.f32 %v1657_v46, %v1657_v46 }
0x125a   :  { %p2391_p4 = pnand %p2390_p3, %p2384_p0 }
0x125b   :  { %v1666_v49 = vadd.f32 %v1664_v9, %v1654_v36  ;;  %v1663_v50 = vmul.f32 %v1661_v48, %v1657_v46 }
0x125d   :  { %v1668_v52 = vmul.f32 0.7978846, %v1666_v49  ;;  %v1665_v38 = vmul.f32 0.044715, %v1663_v50 }
0x125f   :  { %2373 = vtanh.f32 %v1668_v52  ;;  %v1667_v56 = vadd.f32 %v1665_v38, %v1657_v46 }
0x1261   :  { %v1669_v58 = vmul.f32 0.7978846, %v1667_v56 }
0x1263   :  { %2375 = vtanh.f32 %v1669_v58 }
0x126c   :  { %v2374_v60 = vpop.eup %2373 }
0x126d   :  { %v1672_v42 = vadd.f32 1.0, %v2374_v60 }
0x126f   :  { %v1674_v31 = vmul.f32 0.5, %v1672_v42 }
0x1270   :  { %v2376_v61 = vpop.eup %2375 }
0x1271   :  { %v1673_v62 = vadd.f32 1.0, %v2376_v61  ;;  %v1676_v63 = vmul.f32 %v1674_v31, %v1654_v36 }
0x1273   :  { %v1675_v47 = vmul.f32 0.5, %v1673_v62 }
0x1275   :  { %v1677_v32 = vmul.f32 %v1675_v47, %v1657_v46 }
0x1277   :  { %v1678_v0 = vpack.c.bf16 %v1677_v32, %v1676_v63 }
0x1279   :  { %2259 = vmatmul.mubr.msk.bf16.vlgmr.msra.gmra.mxu0 %vm860_vm5, %v1678_v0 }
0x1339   :  { %v1744_v1 = vpop.f32.mrf.mxu0 }
0x133a   :  { %v1745_v55 = vadd.f32 %v1744_v1, %v1682_v51 }
0x133b   :  { %v2260_v2 = vpop.f32.mrf.mxu0 }
0x133c   :  { %v1751_v3 = vadd.f32 %v1745_v55, %v1595_v57 }
0x133d   :  { %v1747_v4 = vpop.f32.mrf.mxu0 }
0x133e   :  { %v1748_v39 = vadd.f32 %v1747_v4, %v1682_v51  ;;  %v1753_v6 = vsel %vm53_vm0, %v1751_v3, 0.0 }
0x133f   :  { %1754 = vadd.xlane.f32.xlu1 %v1753_v6  ;;  %v2261_v7 = vpop.f32.mrf.mxu0 }
0x1340   :  { %v1752_v40 = vadd.f32 %v1748_v39, %v1596_v27 }
0x1342   :  { %v1756_v8 = vsel %vm53_vm0, %v1752_v40, 0.0 }
0x1343   :  { %1757 = vadd.xlane.f32.xlu0 %v1756_v8 }
0x13c8   :  { %v1755_v10 = vpop.xlane.xlu1 %1754 }
0x13c9   :  { %v1759_v11 = vmul.f32 0.03125, %v1755_v10 }
0x13cb   :  { %v1761_v13 = vsub.f32 %v1751_v3, %v1759_v11 }
0x13cc   :  { %v1758_v14 = vpop.xlane.xlu0 %1757 }
0x13cd   :  { %v1760_v16 = vmul.f32 0.03125, %v1758_v14  ;;  %v1763_v59 = vmul.f32 %v1761_v13, %v1761_v13 }
0x13cf   :  { %v1762_v17 = vsub.f32 %v1752_v40, %v1760_v16  ;;  %v1765_v18 = vsel %vm53_vm0, %v1763_v59, 0.0 }
0x13d0   :  { %1766 = vadd.xlane.f32.xlu1 %v1765_v18 }
0x13d1   :  { %v1764_v19 = vmul.f32 %v1762_v17, %v1762_v17 }
0x13d3   :  { %v1768_v20 = vsel %vm53_vm0, %v1764_v19, 0.0 }
0x13d4   :  { %1769 = vadd.xlane.f32.xlu0 %v1768_v20 }
0x1459   :  { %v1767_v23 = vpop.xlane.xlu1 %1766 }
0x145a   :  { %v1771_v24 = vmul.f32 0.03125, %v1767_v23 }
0x145c   :  { %v1773_v25 = vadd.f32 1e-12, %v1771_v24 }
0x145d   :  { %v1770_v57 = vpop.xlane.xlu0 %1769 }
0x145e   :  { %2377 = vrsqrt.f32 %v1773_v25  ;;  %v1772_v27 = vmul.f32 0.03125, %v1770_v57 }
0x1460   :  { %v1774_v28 = vadd.f32 1e-12, %v1772_v27 }
0x1462   :  { %2379 = vrsqrt.f32 %v1774_v28 }
0x146b   :  { %v2378_v5 = vpop.eup %2377 }
0x146c   :  { %v1777_v29 = vmul.f32 %v2378_v5, %v1761_v13 }
0x146e   :  { %v1783_v35 = vmul.f32 %v1782_v12, %v1777_v29 }
0x146f   :  { %v2380_v33 = vpop.eup %2379 }
0x1470   :  { %v1778_v34 = vmul.f32 %v2380_v33, %v1762_v17  ;;  %v1789_v44 = vadd.f32 %v1788_v37, %v1783_v35 }
0x1472   :  { %v1784_v36 = vmul.f32 %v1782_v12, %v1778_v34 }
0x1474   :  { %v1790_v43 = vadd.f32 %v1788_v37, %v1784_v36 }
0x1476   :  { %v1792_v45 = vrot.slane %v1790_v43, 7 }
0x1478   :  { %v1795_v46 = vsel %vm1794_vm6, %v1789_v44, %v1792_v45 }
0x1479   :  { %v1796_v41 = vpack.c.bf16 %v1795_v46, %v1795_v46 }
0x147b   :  { %2267 = vmatmul.mubr.msk.bf16.vlgmr.msra.gmra.mxu1 %vm53_vm0, %v1796_v41 }
0x147c   :  { %2274 = vmatprep.mubr.msk.bf16.mxu1 %vm2406_vm1, %v2405_v15  ;;  %2271 = vmatpush3.bf16.msra.mxu1 %v2319_v26 }
0x147d   :  { %2272 = vmatprep.subr.bf16.mxu1 %v2405_v15  ;;  %v2024_v15 = vld [vmem:[%s2922_s13] ss:$0 sm:$0xff] }
0x1480   :  { %2273 = vmatpush3.bf16.msra.mxu1 %v2320_v54 }
0x153b   :  { %v1857_v53 = vpop.f32.mrf.mxu1 }
0x153c   :  { %v1858_v9 = vadd.f32 %v2020_v30, %v1857_v53 }
0x153d   :  { %v2268_v48 = vpop.f32.mrf.mxu1 }
0x153e   :  { %2381 = vtanh.f32 %v1858_v9 }
0x153f   :  { %v1860_v49 = vpop.f32.mrf.mxu1 }
0x1541   :  { %v2269_v50 = vpop.f32.mrf.mxu1 }
0x154b   :  { %v2382_v52 = vpop.eup %2381 }
0x154c   :  { %v1864_v38 = vpack.c.bf16 %v2382_v52, %v2382_v52 }
0x154e   :  { %2275 = vmatmul.mubr.msk.bf16.vlgmr.msra.gmra.mxu1 %vm53_vm0, %v1864_v38 }
0x160e   :  { %v1925_v56 = vpop.f32.mrf.mxu1 }
0x160f   :  { %v1926_v58 = vadd.f32 %v2024_v15, %v1925_v56 }
0x1610   :  { %v2276_v60 = vpop.f32.mrf.mxu1 }
0x1611   :  { %1932 = vst.msk [vmem:[#allocation2] sm:$0x3] %vm1931_vm7, %v1926_v58 }
0x1612   :  { %v1928_v42 = vpop.f32.mrf.mxu1 }
0x1613   :  { %2394 = shalt.err (!%p2391_p4)
}
0x1614   :  { %1942 = dma.vmem_to_hbm [thread:$0]  %s1940_s1, 32, %s2923_s14, [#allocation3]   ;;  %v2277_v61 = vpop.f32.mrf.mxu1 }
0x1615   :  { %2403 = dma.done.wait [#allocation3], 32  }
0x1616   :  { %2404 = vsyncadd [#allocation3], 4294967264 }
0x1617   :  { %1946 = vsyncpa [#allocation3], 1 }

</bundles_post_ra>
